<compile_context>
chip_gen: v7x
topology: tpu7x:2x2x1
jax: 0.10.0
libtpu: 0.0.40
codegen_flags: <defaults>
</compile_context>

<pallas_src>
import functools

import jax
import jax.numpy as jnp
from jax.experimental import pallas as pl
from jax.experimental.pallas import tpu as pltpu

LN_EPS = 1e-5        # torch.nn.LayerNorm default eps
PAIRNORM_EPS = 1e-5  # torch_geometric.nn.PairNorm default eps

# Matmul-operand / activation-transport dtype.  bf16 halves HBM traffic on this
# memory-bound model and feeds the bf16 MXU; accumulation and all
# normalisation math stay in f32.  (Set both to jnp.float32 for exact f32.)
WDTYPE = jnp.bfloat16
ADTYPE = jnp.bfloat16


def _select_chip_budget():
    """Generation-aware row-tile cap and scoped-VMEM budget."""
    try:
        kind = jax.devices()[0].device_kind.lower()
    except Exception:  # pragma: no cover - defensive; keeps import safe anywhere
        kind = ""
    if "v5" in kind or "v6" in kind:
        # 128 MiB physical VMEM: allow bigger tiles and a bigger scoped budget.
        return 16384, 64 * 1024 * 1024
    # v7x (64 MiB / TC) and unknown chips: conservative budget.
    return 8192, 32 * 1024 * 1024


MAX_BLOCK_ROWS, VMEM_LIMIT_BYTES = _select_chip_budget()

_ROW_PARALLEL = pltpu.CompilerParams(
    dimension_semantics=("parallel",),
    vmem_limit_bytes=VMEM_LIMIT_BYTES,
)


def _block_rows(rows):
    """Row-tile size: as big as the cap allows, but always >=2 grid steps when
    rows > 8 so v7x megacore can shard the parallel row axis."""
    if rows > MAX_BLOCK_ROWS:
        return MAX_BLOCK_ROWS
    if rows <= 8:
        return rows                      # full extent (satisfies the (8,128) rule)
    half = -(-rows // 2)                 # ceil(rows / 2)
    return min(rows, -(-half // 8) * 8)  # round up to a multiple of 8


def _full_spec(arr):
    # Whole-array block with a constant index map -> stays VMEM-resident
    # across the row grid (no per-step re-DMA).
    return pl.BlockSpec(arr.shape, lambda i: (0,) * arr.ndim)


def _row_spec(tm, width):
    return pl.BlockSpec((tm, width), lambda i: (i, 0))


# ---------------------------------------------------------------------------
# Generic fused MLP kernel
#   optional GINE combine ((1+eps)*x + aggr, eps from SMEM)
#   or concat-free split first layer (sum_i inputs[i] @ W_i)
#   + Linear/ReLU stack + optional final ReLU + optional LayerNorm
# Parameters arrive packed: stacked rest-weights (n_rest, d, d) and one
# (k, d) f32 vector array holding [first bias, rest biases..., gamma, beta].
# ---------------------------------------------------------------------------
def _make_fused_kernel(n_inputs, n_first_w, n_rest, has_eps, final_relu, has_ln):
    def kernel(*refs):
        out_ref = refs[-1]
        idx = 0
        if has_eps:
            eps = refs[idx][0]                       # scalar from SMEM
            idx += 1
        acts = refs[idx:idx + n_inputs]
        idx += n_inputs
        first_ws = refs[idx:idx + n_first_w]
        idx += n_first_w
        rest_w_ref = None
        if n_rest:
            rest_w_ref = refs[idx]
            idx += 1
        vec_ref = refs[idx]                          # (k, d) f32 biases / LN params

        if has_eps:
            # GINEConv combine in f32: (1 + eps) * x + aggr
            h_in = ((1.0 + eps) * acts[0][...].astype(jnp.float32)
                    + acts[1][...].astype(jnp.float32))
            w = first_ws[0][...]
            h = jnp.dot(h_in.astype(w.dtype), w, preferred_element_type=jnp.float32)
        else:
            # "concat(inputs) @ W" expressed as a sum of per-chunk matmuls.
            h = jnp.dot(acts[0][...], first_ws[0][...],
                        preferred_element_type=jnp.float32)
            for i in range(1, n_first_w):
                h = h + jnp.dot(acts[i][...], first_ws[i][...],
                                preferred_element_type=jnp.float32)

        v = 0
        h = h + vec_ref[v:v + 1, :]                  # first-layer bias (f32)
        v += 1

        for l in range(n_rest):
            h = jnp.maximum(h, 0.0)                  # inter-layer ReLU
            w = rest_w_ref[l]                        # (d, d) static slice
            h = (jnp.dot(h.astype(w.dtype), w, preferred_element_type=jnp.float32)
                 + vec_ref[v:v + 1, :])
            v += 1

        if final_relu:
            h = jnp.maximum(h, 0.0)

        if has_ln:                                   # LayerNorm over last dim (f32)
            gamma = vec_ref[v:v + 1, :]
            beta = vec_ref[v + 1:v + 2, :]
            mu = jnp.mean(h, axis=-1, keepdims=True)
            var = jnp.mean((h - mu) ** 2, axis=-1, keepdims=True)
            h = (h - mu) * jax.lax.rsqrt(var + LN_EPS) * gamma + beta

        out_ref[...] = h.astype(out_ref.dtype)

    return kernel


def fused_mlp(inputs, first_ws, first_b, rest_layers, *, gine_eps=None,
              final_relu=False, ln=None, out_dtype=ADTYPE):
    """Row-tiled fused MLP.

    inputs      : list of [rows, d_i] activations.
                  gine_eps given  -> inputs = [x, aggr], single first-layer W.
                  gine_eps absent -> first layer = sum_i inputs[i] @ first_ws[i]
                                     (concat-free split of a row-blocked W).
    first_ws    : list of first-layer weight blocks.
    first_b     : first-layer bias.
    rest_layers : list of (W, b) for the remaining Linear layers (ReLU between).
    """
    rows = inputs[0].shape[0]
    tm = _block_rows(rows)
    grid = (pl.cdiv(rows, tm),)
    out_dim = rest_layers[-1][0].shape[1] if rest_layers else first_ws[0].shape[1]

    call_inputs = []
    in_specs = []
    if gine_eps is not None:
        call_inputs.append(jnp.reshape(gine_eps, (1,)).astype(jnp.float32))
        in_specs.append(pl.BlockSpec(memory_space=pltpu.MemorySpace.SMEM))
    for a in inputs:
        # bf16 transport for every row-tiled activation (including the GINE
        # aggregate); the combine / accumulation stays in f32 inside the kernel.
        a = a.astype(ADTYPE)
        call_inputs.append(a)
        in_specs.append(_row_spec(tm, a.shape[1]))

    for w in first_ws:
        wq = w.astype(WDTYPE)
        call_inputs.append(wq)
        in_specs.append(_full_spec(wq))

    if rest_layers:
        rest_w = jnp.stack([w for w, _ in rest_layers]).astype(WDTYPE)
        call_inputs.append(rest_w)                   # (n_rest, d, d)
        in_specs.append(_full_spec(rest_w))

    # Pack all (1, d) f32 vectors into one (k, d) array: fewer per-call inputs.
    vecs = [jnp.reshape(first_b, (1, -1))]
    vecs += [jnp.reshape(b, (1, -1)) for _, b in rest_layers]
    if ln is not None:
        gamma, beta = ln
        vecs += [jnp.reshape(gamma, (1, -1)), jnp.reshape(beta, (1, -1))]
    widths = {v.shape[1] for v in vecs}
    assert len(widths) == 1, "packed bias/LN vectors must share one width"
    vec = jnp.concatenate(vecs, axis=0).astype(jnp.float32)
    call_inputs.append(vec)
    in_specs.append(_full_spec(vec))

    kernel = _make_fused_kernel(
        n_inputs=len(inputs), n_first_w=len(first_ws), n_rest=len(rest_layers),
        has_eps=gine_eps is not None, final_relu=final_relu, has_ln=ln is not None)

    return pl.pallas_call(
        kernel,
        grid=grid,
        out_shape=jax.ShapeDtypeStruct((rows, out_dim), out_dtype),
        in_specs=in_specs,
        out_specs=_row_spec(tm, out_dim),
        compiler_params=_ROW_PARALLEL,
    )(*call_inputs)


# ---------------------------------------------------------------------------
# Output head kernel:
#   split Linear(3*dim->dim) -> ReLU -> LayerNorm -> Linear(dim->4) -> mean(dim=1)
# The mean is folded into the last Linear (W2.mean(axis=1), b2.mean()), so the
# kernel emits a (rows, 1) result directly.
# ---------------------------------------------------------------------------
def _out_head_kernel(b2_ref, a_ref, b_ref, c_ref, w_ref, vec_ref, w2_ref, out_ref):
    h = (jnp.dot(a_ref[...], w_ref[0], preferred_element_type=jnp.float32)
         + jnp.dot(b_ref[...], w_ref[1], preferred_element_type=jnp.float32)
         + jnp.dot(c_ref[...], w_ref[2], preferred_element_type=jnp.float32)
         + vec_ref[0:1, :])                          # out1 bias
    h = jnp.maximum(h, 0.0)
    mu = jnp.mean(h, axis=-1, keepdims=True)
    var = jnp.mean((h - mu) ** 2, axis=-1, keepdims=True)
    h = (h - mu) * jax.lax.rsqrt(var + LN_EPS) * vec_ref[1:2, :] + vec_ref[2:3, :]
    # mean(out2(h), dim=1) folded into a single reduction against W2's column mean.
    out_ref[...] = jnp.sum(h * w2_ref[...], axis=-1, keepdims=True) + b2_ref[0]


def out_head(x_src, x_dst, ea, out1_parts, out1_b, out_bn, out2):
    rows = x_src.shape[0]
    tm = _block_rows(rows)
    grid = (pl.cdiv(rows, tm),)
    gamma, beta = out_bn
    w2, b2 = out2
    # Fold torch.mean(dim=1) into the last Linear.
    w2_eff = jnp.reshape(jnp.mean(w2, axis=1), (1, -1)).astype(jnp.float32)  # (1, dim)
    b2_eff = jnp.reshape(jnp.mean(b2), (1,)).astype(jnp.float32)             # scalar

    acts = [x_src.astype(ADTYPE), x_dst.astype(ADTYPE), ea.astype(ADTYPE)]
    w_stack = jnp.stack(out1_parts).astype(WDTYPE)                 # (3, dim, dim)
    vec = jnp.stack([out1_b, gamma, beta]).astype(jnp.float32)     # (3, dim)

    in_specs = ([pl.BlockSpec(memory_space=pltpu.MemorySpace.SMEM)]
                + [_row_spec(tm, a.shape[1]) for a in acts]
                + [_full_spec(w_stack), _full_spec(vec), _full_spec(w2_eff)])

    pre = pl.pallas_call(
        _out_head_kernel,
        grid=grid,
        out_shape=jax.ShapeDtypeStruct((rows, 1), jnp.float32),
        in_specs=in_specs,
        out_specs=_row_spec(tm, 1),
        compiler_params=_ROW_PARALLEL,
    )(b2_eff, *acts, w_stack, vec, w2_eff)
    return pre[:, 0]


# ---------------------------------------------------------------------------
# Graph glue (data-dependent indices) in plain JAX
# ---------------------------------------------------------------------------
def pair_norm(x, batch, num_graphs):
    # TODO(synk): per-graph scatter-mean has data-dependent indices; kept in XLA.
    xf = x.astype(jnp.float32)
    ones = jnp.ones((xf.shape[0],), jnp.float32)
    counts = jax.ops.segment_sum(ones, batch, num_segments=num_graphs)
    mean = jax.ops.segment_sum(xf, batch, num_segments=num_graphs) / counts[:, None]
    xc = xf - mean[batch]
    sq = jnp.sum(xc * xc, axis=-1)
    msq = jax.ops.segment_sum(sq, batch, num_segments=num_graphs) / counts
    out = xc / jnp.sqrt(PAIRNORM_EPS + msq[batch])[:, None]
    return out.astype(ADTYPE)


def gine_layer(x, edge_attr, src, dst, mlp_layers, eps):
    # TODO(synk): gather x[src] / scatter-add over dst are data-dependent; kept in
    # XLA (which fuses the add+ReLU message into the gather / segment-sum).
    msg = jnp.maximum(jnp.take(x, src, axis=0).astype(jnp.float32)
                      + edge_attr.astype(jnp.float32), 0.0)
    agg = jax.ops.segment_sum(msg, dst, num_segments=x.shape[0])
    (w0, b0) = mlp_layers[0]
    # F.relu(GINEConv(...)) fused into the MLP kernel via final_relu=True; the
    # (1+eps)*x + agg combine happens inside the kernel (eps via SMEM).  The
    # aggregate is shipped to the kernel as bf16 (combine is still f32).
    return fused_mlp([x, agg.astype(ADTYPE)], [w0], b0, list(mlp_layers[1:]),
                     gine_eps=eps, final_relu=True)


# ---------------------------------------------------------------------------
# Parameters
# ---------------------------------------------------------------------------
def _linear(key, fan_in, fan_out):
    kw, kb = jax.random.split(key)
    bound = 1.0 / (fan_in ** 0.5)
    w = jax.random.uniform(kw, (fan_in, fan_out), jnp.float32, -bound, bound)
    b = jax.random.uniform(kb, (fan_out,), jnp.float32, -bound, bound)
    return w, b


def _ln(d):
    return jnp.ones((d,), jnp.float32), jnp.zeros((d,), jnp.float32)


def init_params(key, num_features, num_edge_features, dim):
    keys = iter(jax.random.split(key, 32))
    nf, nef = num_features, num_edge_features
    p = {}
    p['init_mlp'] = [_linear(next(keys), nf, nef), _linear(next(keys), nef, nef)]
    p['init_bn'] = _ln(nef)
    p['init_emlp'] = [_linear(next(keys), nef, nef), _linear(next(keys), nef, nef)]
    p['init_ebn'] = _ln(nef)
    p['mlp1'] = [_linear(next(keys), nef, dim), _linear(next(keys), dim, dim),
                 _linear(next(keys), dim, dim)]
    p['eps1'] = jnp.float32(0.0)              # GINEConv train_eps init
    p['e_mlp1'] = [_linear(next(keys), nef, dim), _linear(next(keys), dim, dim),
                   _linear(next(keys), dim, dim)]
    p['e_bn1'] = _ln(dim)
    p['mlp2'] = [_linear(next(keys), dim, dim), _linear(next(keys), dim, dim),
                 _linear(next(keys), dim, dim)]
    p['eps2'] = jnp.float32(0.0)
    p['e_mlp2'] = [_linear(next(keys), 3 * dim, dim), _linear(next(keys), dim, dim),
                   _linear(next(keys), dim, dim)]
    p['ebn2'] = _ln(dim)
    p['mlp3'] = [_linear(next(keys), dim, dim), _linear(next(keys), dim, dim),
                 _linear(next(keys), dim, dim)]
    p['eps3'] = jnp.float32(0.0)
    p['e_mlp3'] = [_linear(next(keys), 3 * dim, dim), _linear(next(keys), dim, dim),
                   _linear(next(keys), dim, dim)]
    # ebn3 exists in __init__ but is never used in forward (forward reuses ebn2).
    p['out1'] = _linear(next(keys), 3 * dim, dim)
    p['out_bn'] = _ln(dim)
    p['out2'] = _linear(next(keys), dim, 4)
    return p


# ---------------------------------------------------------------------------
# Full forward pass (mirrors Net.forward exactly)
# ---------------------------------------------------------------------------
def net_forward(params, x, edge_attr, edge_index, batch, num_graphs):
    src, dst = edge_index[0], edge_index[1]

    def run_mlp(h, layers, *, final_relu, ln):
        (w0, b0) = layers[0]
        return fused_mlp([h], [w0], b0, list(layers[1:]),
                         final_relu=final_relu, ln=ln)

    def run_concat_mlp(a, b, c, layers, *, final_relu, ln):
        w0, b0 = layers[0]
        w0a, w0b, w0c = jnp.split(w0, 3, axis=0)   # concat-free split matmul
        return fused_mlp([a, b, c], [w0a, w0b, w0c], b0, list(layers[1:]),
                         final_relu=final_relu, ln=ln)

    # x = relu(init_mlp(x)); x = init_bn(x)
    x = run_mlp(x, params['init_mlp'], final_relu=True, ln=params['init_bn'])
    # edge_attr = init_emlp(edge_attr); edge_attr = init_ebn(edge_attr)
    ea = run_mlp(edge_attr, params['init_emlp'], final_relu=False,
                 ln=params['init_ebn'])

    # x = relu(gin1(x, edge_index, edge_attr)); x = PairNorm(x, batch)
    x = gine_layer(x, ea, src, dst, params['mlp1'], params['eps1'])
    x = pair_norm(x, batch, num_graphs)
    # edge_attr = relu(e_mlp1(edge_attr)); edge_attr = e_bn1(edge_attr)
    ea = run_mlp(ea, params['e_mlp1'], final_relu=True, ln=params['e_bn1'])

    # x = relu(gin2(...)); x = PairNorm(x, batch)
    x = gine_layer(x, ea, src, dst, params['mlp2'], params['eps2'])
    x = pair_norm(x, batch, num_graphs)
    # edge_attr = cat([x[src], x[dst], edge_attr]); e_mlp2; ebn2   (concat-free)
    x_src = jnp.take(x, src, axis=0)
    x_dst = jnp.take(x, dst, axis=0)
    ea = run_concat_mlp(x_src, x_dst, ea, params['e_mlp2'],
                        final_relu=False, ln=params['ebn2'])

    # x = relu(gin3(...)); x = PairNorm(x, batch)
    x = gine_layer(x, ea, src, dst, params['mlp3'], params['eps3'])
    x = pair_norm(x, batch, num_graphs)
    # edge_attr = cat(...); e_mlp3; ebn2 (original forward reuses ebn2, preserved)
    x_src = jnp.take(x, src, axis=0)
    x_dst = jnp.take(x, dst, axis=0)
    ea = run_concat_mlp(x_src, x_dst, ea, params['e_mlp3'],
                        final_relu=False, ln=params['ebn2'])

    # x = cat([x[src], x[dst], edge_attr]); relu(out1); out_bn; out2; mean(dim=1)
    w1, b1 = params['out1']
    w1a, w1b, w1c = jnp.split(w1, 3, axis=0)
    return out_head(x_src, x_dst, ea, (w1a, w1b, w1c), b1,
                    params['out_bn'], params['out2'])


# ---------------------------------------------------------------------------
if __name__ == "__main__":
    num_features, num_edge_features, dim = 16, 16, 32
    N, E, G = 16, 24, 2   # 2 graphs of 8 nodes each, 12 edges per graph

    root = jax.random.PRNGKey(0)
    kparam, kx, ke, ks, kd = jax.random.split(root, 5)

    params = init_params(kparam, num_features, num_edge_features, dim)

    x = jax.random.normal(kx, (N, num_features), jnp.float32)
    edge_attr = jax.random.normal(ke, (E, num_edge_features), jnp.float32)
    src0 = jax.random.randint(ks, (E // 2,), 0, 8, dtype=jnp.int32)
    dst0 = jax.random.randint(kd, (E // 2,), 0, 8, dtype=jnp.int32)
    src = jnp.concatenate([src0, src0 + 8])
    dst = jnp.concatenate([dst0, dst0 + 8])
    edge_index = jnp.stack([src, dst]).astype(jnp.int32)
    batch = jnp.concatenate([jnp.zeros(8, jnp.int32), jnp.ones(8, jnp.int32)])

    fwd = jax.jit(functools.partial(net_forward, num_graphs=G))
    out = fwd(params, x, edge_attr, edge_index, batch)
    out = jax.block_until_ready(out)

    assert out.shape == (E,), out.shape
    assert bool(jnp.all(jnp.isfinite(out)))
    print("KERNEL_OK")
</pallas_src>

<mosaic_0001>
module attributes {stable_mosaic.version = 11 : i64} {
  func.func private @main(%arg0: i32) attributes {dimension_semantics = [#tpu.dimension_semantics<core_parallel>], iteration_bounds = array<i64: 2>, tpu.core_type = #tpu.core_type<sc_scalar_subcore>, window_params = []} {
    return
  }
}

module attributes {stable_mosaic.version = 11 : i64} {
  func.func private @main(%arg0: i32) attributes {dimension_semantics = [#tpu.dimension_semantics<core_parallel>], iteration_bounds = array<i64: 2>, tpu.core_type = #tpu.core_type<sc_scalar_subcore>, window_params = []} {
    return
  }
}

module attributes {stable_mosaic.version = 11 : i64} {
  func.func @kernel(%arg0: i32, %arg1: memref<16x16xbf16, #tpu.memory_space<vmem>>, %arg2: memref<16x16xbf16, #tpu.memory_space<vmem>>, %arg3: memref<1x16x16xbf16, #tpu.memory_space<vmem>>, %arg4: memref<4x16xf32, #tpu.memory_space<vmem>>, %arg5: memref<16x16xbf16, #tpu.memory_space<vmem>>) attributes {dimension_semantics = [#tpu.dimension_semantics<parallel>], iteration_bounds = array<i64: 2>, scalar_prefetch = 0 : i64, scratch_operands = 0 : i64, tpu.core_type = #tpu.core_type<tc>, window_params = [{transform_indices = @transform_0, window_bounds = array<i64: 16, 16>}, {pipeline_mode = #tpu.pipeline_mode<synchronous>, transform_indices = @transform_1, window_bounds = array<i64: 16, 16>}, {pipeline_mode = #tpu.pipeline_mode<synchronous>, transform_indices = @transform_2, window_bounds = array<i64: 1, 16, 16>}, {pipeline_mode = #tpu.pipeline_mode<synchronous>, transform_indices = @transform_3, window_bounds = array<i64: 4, 16>}, {transform_indices = @transform_4, window_bounds = array<i64: 16, 16>}]} {
    %c0 = arith.constant 0 : index
    %c0_0 = arith.constant 0 : index
    %0 = vector.load %arg1[%c0, %c0_0] : memref<16x16xbf16, #tpu.memory_space<vmem>>, vector<16x16xbf16>
    %c0_1 = arith.constant 0 : index
    %c0_2 = arith.constant 0 : index
    %1 = vector.load %arg2[%c0_1, %c0_2] : memref<16x16xbf16, #tpu.memory_space<vmem>>, vector<16x16xbf16>
    %cst = arith.constant dense<0.000000e+00> : vector<16x16xf32>
    %2 = tpu.matmul %0, %1, %cst {dimension_numbers = #tpu.dot_dimension_numbers<[1], [0], [0], [1], [0, 0, 1, 1], [], []>} : vector<16x16xbf16>, vector<16x16xbf16>, vector<16x16xf32> -> vector<16x16xf32>
    %c0_3 = arith.constant 0 : index
    %c0_4 = arith.constant 0 : index
    %3 = vector.load %arg4[%c0_3, %c0_4] : memref<4x16xf32, #tpu.memory_space<vmem>>, vector<1x16xf32>
    %4 = vector.broadcast %3 : vector<1x16xf32> to vector<16x16xf32>
    %5 = arith.addf %2, %4 : vector<16x16xf32>
    %cst_5 = arith.constant 0.000000e+00 : f32
    %6 = vector.broadcast %cst_5 : f32 to vector<16x16xf32>
    %7 = arith.maximumf %5, %6 : vector<16x16xf32>
    %c0_6 = arith.constant 0 : index
    %c0_7 = arith.constant 0 : index
    %c0_8 = arith.constant 0 : index
    %8 = vector.load %arg3[%c0_6, %c0_7, %c0_8] : memref<1x16x16xbf16, #tpu.memory_space<vmem>>, vector<1x16x16xbf16>
    %9 = vector.shape_cast %8 : vector<1x16x16xbf16> to vector<16x16xbf16>
    %10 = arith.truncf %7 : vector<16x16xf32> to vector<16x16xbf16>
    %cst_9 = arith.constant dense<0.000000e+00> : vector<16x16xf32>
    %11 = tpu.matmul %10, %9, %cst_9 {dimension_numbers = #tpu.dot_dimension_numbers<[1], [0], [0], [1], [0, 0, 1, 1], [], []>} : vector<16x16xbf16>, vector<16x16xbf16>, vector<16x16xf32> -> vector<16x16xf32>
    %c1 = arith.constant 1 : index
    %c0_10 = arith.constant 0 : index
    %12 = vector.load %arg4[%c1, %c0_10] : memref<4x16xf32, #tpu.memory_space<vmem>>, vector<1x16xf32>
    %13 = vector.broadcast %12 : vector<1x16xf32> to vector<16x16xf32>
    %14 = arith.addf %11, %13 : vector<16x16xf32>
    %c2 = arith.constant 2 : index
    %c0_11 = arith.constant 0 : index
    %15 = vector.load %arg4[%c2, %c0_11] : memref<4x16xf32, #tpu.memory_space<vmem>>, vector<1x16xf32>
    %c3 = arith.constant 3 : index
    %c0_12 = arith.constant 0 : index
    %16 = vector.load %arg4[%c3, %c0_12] : memref<4x16xf32, #tpu.memory_space<vmem>>, vector<1x16xf32>
    %cst_13 = arith.constant dense<0.000000e+00> : vector<16xf32>
    %17 = vector.multi_reduction <add>, %14, %cst_13 [1] : vector<16x16xf32> to vector<16xf32>
    %18 = vector.shape_cast %17 : vector<16xf32> to vector<16x1xf32>
    %cst_14 = arith.constant 1.600000e+01 : f32
    %19 = vector.broadcast %cst_14 : f32 to vector<16x1xf32>
    %20 = arith.divf %18, %19 : vector<16x1xf32>
    %21 = vector.broadcast %20 : vector<16x1xf32> to vector<16x16xf32>
    %22 = arith.subf %14, %21 : vector<16x16xf32>
    %23 = arith.mulf %22, %22 : vector<16x16xf32>
    %cst_15 = arith.constant dense<0.000000e+00> : vector<16xf32>
    %24 = vector.multi_reduction <add>, %23, %cst_15 [1] : vector<16x16xf32> to vector<16xf32>
    %25 = vector.shape_cast %24 : vector<16xf32> to vector<16x1xf32>
    %cst_16 = arith.constant 1.600000e+01 : f32
    %26 = vector.broadcast %cst_16 : f32 to vector<16x1xf32>
    %27 = arith.divf %25, %26 : vector<16x1xf32>
    %28 = vector.broadcast %20 : vector<16x1xf32> to vector<16x16xf32>
    %29 = arith.subf %14, %28 : vector<16x16xf32>
    %cst_17 = arith.constant 9.99999974E-6 : f32
    %30 = vector.broadcast %cst_17 : f32 to vector<16x1xf32>
    %31 = arith.addf %27, %30 : vector<16x1xf32>
    %32 = math.rsqrt %31 : vector<16x1xf32>
    %33 = vector.broadcast %32 : vector<16x1xf32> to vector<16x16xf32>
    %34 = arith.mulf %29, %33 : vector<16x16xf32>
    %35 = vector.broadcast %15 : vector<1x16xf32> to vector<16x16xf32>
    %36 = arith.mulf %34, %35 : vector<16x16xf32>
    %37 = vector.broadcast %16 : vector<1x16xf32> to vector<16x16xf32>
    %38 = arith.addf %36, %37 : vector<16x16xf32>
    %39 = arith.truncf %38 : vector<16x16xf32> to vector<16x16xbf16>
    %c0_18 = arith.constant 0 : index
    %c0_19 = arith.constant 0 : index
    %40 = vector.load %arg5[%c0_18, %c0_19] : memref<16x16xbf16, #tpu.memory_space<vmem>>, vector<16x16xbf16>
    tpu.vector_store %arg5[%c0_18, %c0_19], %39 {strides = array<i32>} : memref<16x16xbf16, #tpu.memory_space<vmem>>, vector<16x16xbf16>,
    return
  }
  func.func @transform_0(%arg0: i32) -> (i32, i32) {
    %c0_i32 = arith.constant 0 : i32
    %c0_i32_0 = arith.constant 0 : i32
    return %arg0, %c0_i32 : i32, i32
  }
  func.func @transform_1(%arg0: i32) -> (i32, i32) {
    %c0_i32 = arith.constant 0 : i32
    %c0_i32_0 = arith.constant 0 : i32
    %c0_i32_1 = arith.constant 0 : i32
    return %c0_i32, %c0_i32_0 : i32, i32
  }
  func.func @transform_2(%arg0: i32) -> (i32, i32, i32) {
    %c0_i32 = arith.constant 0 : i32
    %c0_i32_0 = arith.constant 0 : i32
    %c0_i32_1 = arith.constant 0 : i32
    %c0_i32_2 = arith.constant 0 : i32
    return %c0_i32, %c0_i32_0, %c0_i32_1 : i32, i32, i32
  }
  func.func @transform_3(%arg0: i32) -> (i32, i32) {
    %c0_i32 = arith.constant 0 : i32
    %c0_i32_0 = arith.constant 0 : i32
    %c0_i32_1 = arith.constant 0 : i32
    return %c0_i32, %c0_i32_0 : i32, i32
  }
  func.func @transform_4(%arg0: i32) -> (i32, i32) {
    %c0_i32 = arith.constant 0 : i32
    %c0_i32_0 = arith.constant 0 : i32
    return %arg0, %c0_i32 : i32, i32
  }
}

module attributes {stable_mosaic.version = 11 : i64} {
  func.func @kernel(%arg0: i32, %arg1: memref<8x16xbf16, #tpu.memory_space<vmem>>, %arg2: memref<16x16xbf16, #tpu.memory_space<vmem>>, %arg3: memref<1x16x16xbf16, #tpu.memory_space<vmem>>, %arg4: memref<4x16xf32, #tpu.memory_space<vmem>>, %arg5: memref<8x16xbf16, #tpu.memory_space<vmem>>) attributes {dimension_semantics = [#tpu.dimension_semantics<parallel>], iteration_bounds = array<i64: 2>, scalar_prefetch = 0 : i64, scratch_operands = 0 : i64, tpu.core_type = #tpu.core_type<tc>, window_params = [{transform_indices = @transform_0, window_bounds = array<i64: 8, 16>}, {pipeline_mode = #tpu.pipeline_mode<synchronous>, transform_indices = @transform_1, window_bounds = array<i64: 16, 16>}, {pipeline_mode = #tpu.pipeline_mode<synchronous>, transform_indices = @transform_2, window_bounds = array<i64: 1, 16, 16>}, {pipeline_mode = #tpu.pipeline_mode<synchronous>, transform_indices = @transform_3, window_bounds = array<i64: 4, 16>}, {transform_indices = @transform_4, window_bounds = array<i64: 8, 16>}]} {
    %c0 = arith.constant 0 : index
    %c0_0 = arith.constant 0 : index
    %0 = vector.load %arg1[%c0, %c0_0] : memref<8x16xbf16, #tpu.memory_space<vmem>>, vector<8x16xbf16>
    %c0_1 = arith.constant 0 : index
    %c0_2 = arith.constant 0 : index
    %1 = vector.load %arg2[%c0_1, %c0_2] : memref<16x16xbf16, #tpu.memory_space<vmem>>, vector<16x16xbf16>
    %cst = arith.constant dense<0.000000e+00> : vector<8x16xf32>
    %2 = tpu.matmul %0, %1, %cst {dimension_numbers = #tpu.dot_dimension_numbers<[1], [0], [0], [1], [0, 0, 1, 1], [], []>} : vector<8x16xbf16>, vector<16x16xbf16>, vector<8x16xf32> -> vector<8x16xf32>
    %c0_3 = arith.constant 0 : index
    %c0_4 = arith.constant 0 : index
    %3 = vector.load %arg4[%c0_3, %c0_4] : memref<4x16xf32, #tpu.memory_space<vmem>>, vector<1x16xf32>
    %4 = vector.broadcast %3 : vector<1x16xf32> to vector<8x16xf32>
    %5 = arith.addf %2, %4 : vector<8x16xf32>
    %cst_5 = arith.constant 0.000000e+00 : f32
    %6 = vector.broadcast %cst_5 : f32 to vector<8x16xf32>
    %7 = arith.maximumf %5, %6 : vector<8x16xf32>
    %c0_6 = arith.constant 0 : index
    %c0_7 = arith.constant 0 : index
    %c0_8 = arith.constant 0 : index
    %8 = vector.load %arg3[%c0_6, %c0_7, %c0_8] : memref<1x16x16xbf16, #tpu.memory_space<vmem>>, vector<1x16x16xbf16>
    %9 = vector.shape_cast %8 : vector<1x16x16xbf16> to vector<16x16xbf16>
    %10 = arith.truncf %7 : vector<8x16xf32> to vector<8x16xbf16>
    %cst_9 = arith.constant dense<0.000000e+00> : vector<8x16xf32>
    %11 = tpu.matmul %10, %9, %cst_9 {dimension_numbers = #tpu.dot_dimension_numbers<[1], [0], [0], [1], [0, 0, 1, 1], [], []>} : vector<8x16xbf16>, vector<16x16xbf16>, vector<8x16xf32> -> vector<8x16xf32>
    %c1 = arith.constant 1 : index
    %c0_10 = arith.constant 0 : index
    %12 = vector.load %arg4[%c1, %c0_10] : memref<4x16xf32, #tpu.memory_space<vmem>>, vector<1x16xf32>
    %13 = vector.broadcast %12 : vector<1x16xf32> to vector<8x16xf32>
    %14 = arith.addf %11, %13 : vector<8x16xf32>
    %cst_11 = arith.constant 0.000000e+00 : f32
    %15 = vector.broadcast %cst_11 : f32 to vector<8x16xf32>
    %16 = arith.maximumf %14, %15 : vector<8x16xf32>
    %c2 = arith.constant 2 : index
    %c0_12 = arith.constant 0 : index
    %17 = vector.load %arg4[%c2, %c0_12] : memref<4x16xf32, #tpu.memory_space<vmem>>, vector<1x16xf32>
    %c3 = arith.constant 3 : index
    %c0_13 = arith.constant 0 : index
    %18 = vector.load %arg4[%c3, %c0_13] : memref<4x16xf32, #tpu.memory_space<vmem>>, vector<1x16xf32>
    %cst_14 = arith.constant dense<0.000000e+00> : vector<8xf32>
    %19 = vector.multi_reduction <add>, %16, %cst_14 [1] : vector<8x16xf32> to vector<8xf32>
    %20 = vector.shape_cast %19 : vector<8xf32> to vector<8x1xf32>
    %cst_15 = arith.constant 1.600000e+01 : f32
    %21 = vector.broadcast %cst_15 : f32 to vector<8x1xf32>
    %22 = arith.divf %20, %21 : vector<8x1xf32>
    %23 = vector.broadcast %22 : vector<8x1xf32> to vector<8x16xf32>
    %24 = arith.subf %16, %23 : vector<8x16xf32>
    %25 = arith.mulf %24, %24 : vector<8x16xf32>
    %cst_16 = arith.constant dense<0.000000e+00> : vector<8xf32>
    %26 = vector.multi_reduction <add>, %25, %cst_16 [1] : vector<8x16xf32> to vector<8xf32>
    %27 = vector.shape_cast %26 : vector<8xf32> to vector<8x1xf32>
    %cst_17 = arith.constant 1.600000e+01 : f32
    %28 = vector.broadcast %cst_17 : f32 to vector<8x1xf32>
    %29 = arith.divf %27, %28 : vector<8x1xf32>
    %30 = vector.broadcast %22 : vector<8x1xf32> to vector<8x16xf32>
    %31 = arith.subf %16, %30 : vector<8x16xf32>
    %cst_18 = arith.constant 9.99999974E-6 : f32
    %32 = vector.broadcast %cst_18 : f32 to vector<8x1xf32>
    %33 = arith.addf %29, %32 : vector<8x1xf32>
    %34 = math.rsqrt %33 : vector<8x1xf32>
    %35 = vector.broadcast %34 : vector<8x1xf32> to vector<8x16xf32>
    %36 = arith.mulf %31, %35 : vector<8x16xf32>
    %37 = vector.broadcast %17 : vector<1x16xf32> to vector<8x16xf32>
    %38 = arith.mulf %36, %37 : vector<8x16xf32>
    %39 = vector.broadcast %18 : vector<1x16xf32> to vector<8x16xf32>
    %40 = arith.addf %38, %39 : vector<8x16xf32>
    %41 = arith.truncf %40 : vector<8x16xf32> to vector<8x16xbf16>
    %c0_19 = arith.constant 0 : index
    %c0_20 = arith.constant 0 : index
    %42 = vector.load %arg5[%c0_19, %c0_20] : memref<8x16xbf16, #tpu.memory_space<vmem>>, vector<8x16xbf16>
    tpu.vector_store %arg5[%c0_19, %c0_20], %41 {strides = array<i32>} : memref<8x16xbf16, #tpu.memory_space<vmem>>, vector<8x16xbf16>,
    return
  }
  func.func @transform_0(%arg0: i32) -> (i32, i32) {
    %c0_i32 = arith.constant 0 : i32
    %c0_i32_0 = arith.constant 0 : i32
    return %arg0, %c0_i32 : i32, i32
  }
  func.func @transform_1(%arg0: i32) -> (i32, i32) {
    %c0_i32 = arith.constant 0 : i32
    %c0_i32_0 = arith.constant 0 : i32
    %c0_i32_1 = arith.constant 0 : i32
    return %c0_i32, %c0_i32_0 : i32, i32
  }
  func.func @transform_2(%arg0: i32) -> (i32, i32, i32) {
    %c0_i32 = arith.constant 0 : i32
    %c0_i32_0 = arith.constant 0 : i32
    %c0_i32_1 = arith.constant 0 : i32
    %c0_i32_2 = arith.constant 0 : i32
    return %c0_i32, %c0_i32_0, %c0_i32_1 : i32, i32, i32
  }
  func.func @transform_3(%arg0: i32) -> (i32, i32) {
    %c0_i32 = arith.constant 0 : i32
    %c0_i32_0 = arith.constant 0 : i32
    %c0_i32_1 = arith.constant 0 : i32
    return %c0_i32, %c0_i32_0 : i32, i32
  }
  func.func @transform_4(%arg0: i32) -> (i32, i32) {
    %c0_i32 = arith.constant 0 : i32
    %c0_i32_0 = arith.constant 0 : i32
    return %arg0, %c0_i32 : i32, i32
  }
}

module attributes {stable_mosaic.version = 11 : i64} {
  func.func @kernel(%arg0: i32, %arg1: memref<1xf32, #tpu.memory_space<smem>>, %arg2: memref<8x16xbf16, #tpu.memory_space<vmem>>, %arg3: memref<8x16xbf16, #tpu.memory_space<vmem>>, %arg4: memref<16x32xbf16, #tpu.memory_space<vmem>>, %arg5: memref<2x32x32xbf16, #tpu.memory_space<vmem>>, %arg6: memref<3x32xf32, #tpu.memory_space<vmem>>, %arg7: memref<8x32xbf16, #tpu.memory_space<vmem>>) attributes {dimension_semantics = [#tpu.dimension_semantics<parallel>], iteration_bounds = array<i64: 2>, scalar_prefetch = 0 : i64, scratch_operands = 0 : i64, tpu.core_type = #tpu.core_type<tc>, window_params = [{transform_indices = @transform_0, window_bounds = array<i64: 1>}, {transform_indices = @transform_1, window_bounds = array<i64: 8, 16>}, {transform_indices = @transform_2, window_bounds = array<i64: 8, 16>}, {pipeline_mode = #tpu.pipeline_mode<synchronous>, transform_indices = @transform_3, window_bounds = array<i64: 16, 32>}, {pipeline_mode = #tpu.pipeline_mode<synchronous>, transform_indices = @transform_4, window_bounds = array<i64: 2, 32, 32>}, {pipeline_mode = #tpu.pipeline_mode<synchronous>, transform_indices = @transform_5, window_bounds = array<i64: 3, 32>}, {transform_indices = @transform_6, window_bounds = array<i64: 8, 32>}]} {
    %c0 = arith.constant 0 : index
    %0 = memref.load %arg1[%c0] : memref<1xf32, #tpu.memory_space<smem>>
    %cst = arith.constant 1.000000e+00 : f32
    %1 = arith.addf %cst, %0 : f32
    %c0_0 = arith.constant 0 : index
    %c0_1 = arith.constant 0 : index
    %2 = vector.load %arg2[%c0_0, %c0_1] : memref<8x16xbf16, #tpu.memory_space<vmem>>, vector<8x16xbf16>
    %3 = arith.extf %2 : vector<8x16xbf16> to vector<8x16xf32>
    %4 = vector.broadcast %1 : f32 to vector<8x16xf32>
    %5 = arith.mulf %4, %3 : vector<8x16xf32>
    %c0_2 = arith.constant 0 : index
    %c0_3 = arith.constant 0 : index
    %6 = vector.load %arg3[%c0_2, %c0_3] : memref<8x16xbf16, #tpu.memory_space<vmem>>, vector<8x16xbf16>
    %7 = arith.extf %6 : vector<8x16xbf16> to vector<8x16xf32>
    %8 = arith.addf %5, %7 : vector<8x16xf32>
    %c0_4 = arith.constant 0 : index
    %c0_5 = arith.constant 0 : index
    %9 = vector.load %arg4[%c0_4, %c0_5] : memref<16x32xbf16, #tpu.memory_space<vmem>>, vector<16x32xbf16>
    %10 = arith.truncf %8 : vector<8x16xf32> to vector<8x16xbf16>
    %cst_6 = arith.constant dense<0.000000e+00> : vector<8x32xf32>
    %11 = tpu.matmul %10, %9, %cst_6 {dimension_numbers = #tpu.dot_dimension_numbers<[1], [0], [0], [1], [0, 0, 1, 1], [], []>} : vector<8x16xbf16>, vector<16x32xbf16>, vector<8x32xf32> -> vector<8x32xf32>
    %c0_7 = arith.constant 0 : index
    %c0_8 = arith.constant 0 : index
    %12 = vector.load %arg6[%c0_7, %c0_8] : memref<3x32xf32, #tpu.memory_space<vmem>>, vector<1x32xf32>
    %13 = vector.broadcast %12 : vector<1x32xf32> to vector<8x32xf32>
    %14 = arith.addf %11, %13 : vector<8x32xf32>
    %cst_9 = arith.constant 0.000000e+00 : f32
    %15 = vector.broadcast %cst_9 : f32 to vector<8x32xf32>
    %16 = arith.maximumf %14, %15 : vector<8x32xf32>
    %c0_10 = arith.constant 0 : index
    %c0_11 = arith.constant 0 : index
    %c0_12 = arith.constant 0 : index
    %17 = vector.load %arg5[%c0_10, %c0_11, %c0_12] : memref<2x32x32xbf16, #tpu.memory_space<vmem>>, vector<1x32x32xbf16>
    %18 = vector.shape_cast %17 : vector<1x32x32xbf16> to vector<32x32xbf16>
    %19 = arith.truncf %16 : vector<8x32xf32> to vector<8x32xbf16>
    %cst_13 = arith.constant dense<0.000000e+00> : vector<8x32xf32>
    %20 = tpu.matmul %19, %18, %cst_13 {dimension_numbers = #tpu.dot_dimension_numbers<[1], [0], [0], [1], [0, 0, 1, 1], [], []>} : vector<8x32xbf16>, vector<32x32xbf16>, vector<8x32xf32> -> vector<8x32xf32>
    %c1 = arith.constant 1 : index
    %c0_14 = arith.constant 0 : index
    %21 = vector.load %arg6[%c1, %c0_14] : memref<3x32xf32, #tpu.memory_space<vmem>>, vector<1x32xf32>
    %22 = vector.broadcast %21 : vector<1x32xf32> to vector<8x32xf32>
    %23 = arith.addf %20, %22 : vector<8x32xf32>
    %cst_15 = arith.constant 0.000000e+00 : f32
    %24 = vector.broadcast %cst_15 : f32 to vector<8x32xf32>
    %25 = arith.maximumf %23, %24 : vector<8x32xf32>
    %c1_16 = arith.constant 1 : index
    %c0_17 = arith.constant 0 : index
    %c0_18 = arith.constant 0 : index
    %26 = vector.load %arg5[%c1_16, %c0_17, %c0_18] : memref<2x32x32xbf16, #tpu.memory_space<vmem>>, vector<1x32x32xbf16>
    %27 = vector.shape_cast %26 : vector<1x32x32xbf16> to vector<32x32xbf16>
    %28 = arith.truncf %25 : vector<8x32xf32> to vector<8x32xbf16>
    %cst_19 = arith.constant dense<0.000000e+00> : vector<8x32xf32>
    %29 = tpu.matmul %28, %27, %cst_19 {dimension_numbers = #tpu.dot_dimension_numbers<[1], [0], [0], [1], [0, 0, 1, 1], [], []>} : vector<8x32xbf16>, vector<32x32xbf16>, vector<8x32xf32> -> vector<8x32xf32>
    %c2 = arith.constant 2 : index
    %c0_20 = arith.constant 0 : index
    %30 = vector.load %arg6[%c2, %c0_20] : memref<3x32xf32, #tpu.memory_space<vmem>>, vector<1x32xf32>
    %31 = vector.broadcast %30 : vector<1x32xf32> to vector<8x32xf32>
    %32 = arith.addf %29, %31 : vector<8x32xf32>
    %cst_21 = arith.constant 0.000000e+00 : f32
    %33 = vector.broadcast %cst_21 : f32 to vector<8x32xf32>
    %34 = arith.maximumf %32, %33 : vector<8x32xf32>
    %35 = arith.truncf %34 : vector<8x32xf32> to vector<8x32xbf16>
    %c0_22 = arith.constant 0 : index
    %c0_23 = arith.constant 0 : index
    %36 = vector.load %arg7[%c0_22, %c0_23] : memref<8x32xbf16, #tpu.memory_space<vmem>>, vector<8x32xbf16>
    tpu.vector_store %arg7[%c0_22, %c0_23], %35 {strides = array<i32>} : memref<8x32xbf16, #tpu.memory_space<vmem>>, vector<8x32xbf16>,
    return
  }
  func.func @transform_0(%arg0: i32) -> i32 {
    %c0_i32 = arith.constant 0 : i32
    %c0_i32_0 = arith.constant 0 : i32
    return %c0_i32 : i32
  }
  func.func @transform_1(%arg0: i32) -> (i32, i32) {
    %c0_i32 = arith.constant 0 : i32
    %c0_i32_0 = arith.constant 0 : i32
    return %arg0, %c0_i32 : i32, i32
  }
  func.func @transform_2(%arg0: i32) -> (i32, i32) {
    %c0_i32 = arith.constant 0 : i32
    %c0_i32_0 = arith.constant 0 : i32
    return %arg0, %c0_i32 : i32, i32
  }
  func.func @transform_3(%arg0: i32) -> (i32, i32) {
    %c0_i32 = arith.constant 0 : i32
    %c0_i32_0 = arith.constant 0 : i32
    %c0_i32_1 = arith.constant 0 : i32
    return %c0_i32, %c0_i32_0 : i32, i32
  }
  func.func @transform_4(%arg0: i32) -> (i32, i32, i32) {
    %c0_i32 = arith.constant 0 : i32
    %c0_i32_0 = arith.constant 0 : i32
    %c0_i32_1 = arith.constant 0 : i32
    %c0_i32_2 = arith.constant 0 : i32
    return %c0_i32, %c0_i32_0, %c0_i32_1 : i32, i32, i32
  }
  func.func @transform_5(%arg0: i32) -> (i32, i32) {
    %c0_i32 = arith.constant 0 : i32
    %c0_i32_0 = arith.constant 0 : i32
    %c0_i32_1 = arith.constant 0 : i32
    return %c0_i32, %c0_i32_0 : i32, i32
  }
  func.func @transform_6(%arg0: i32) -> (i32, i32) {
    %c0_i32 = arith.constant 0 : i32
    %c0_i32_0 = arith.constant 0 : i32
    return %arg0, %c0_i32 : i32, i32
  }
}

module attributes {stable_mosaic.version = 11 : i64} {
  func.func @kernel(%arg0: i32, %arg1: memref<16x16xbf16, #tpu.memory_space<vmem>>, %arg2: memref<16x32xbf16, #tpu.memory_space<vmem>>, %arg3: memref<2x32x32xbf16, #tpu.memory_space<vmem>>, %arg4: memref<5x32xf32, #tpu.memory_space<vmem>>, %arg5: memref<16x32xbf16, #tpu.memory_space<vmem>>) attributes {dimension_semantics = [#tpu.dimension_semantics<parallel>], iteration_bounds = array<i64: 2>, scalar_prefetch = 0 : i64, scratch_operands = 0 : i64, tpu.core_type = #tpu.core_type<tc>, window_params = [{transform_indices = @transform_0, window_bounds = array<i64: 16, 16>}, {pipeline_mode = #tpu.pipeline_mode<synchronous>, transform_indices = @transform_1, window_bounds = array<i64: 16, 32>}, {pipeline_mode = #tpu.pipeline_mode<synchronous>, transform_indices = @transform_2, window_bounds = array<i64: 2, 32, 32>}, {pipeline_mode = #tpu.pipeline_mode<synchronous>, transform_indices = @transform_3, window_bounds = array<i64: 5, 32>}, {transform_indices = @transform_4, window_bounds = array<i64: 16, 32>}]} {
    %c0 = arith.constant 0 : index
    %c0_0 = arith.constant 0 : index
    %0 = vector.load %arg1[%c0, %c0_0] : memref<16x16xbf16, #tpu.memory_space<vmem>>, vector<16x16xbf16>
    %c0_1 = arith.constant 0 : index
    %c0_2 = arith.constant 0 : index
    %1 = vector.load %arg2[%c0_1, %c0_2] : memref<16x32xbf16, #tpu.memory_space<vmem>>, vector<16x32xbf16>
    %cst = arith.constant dense<0.000000e+00> : vector<16x32xf32>
    %2 = tpu.matmul %0, %1, %cst {dimension_numbers = #tpu.dot_dimension_numbers<[1], [0], [0], [1], [0, 0, 1, 1], [], []>} : vector<16x16xbf16>, vector<16x32xbf16>, vector<16x32xf32> -> vector<16x32xf32>
    %c0_3 = arith.constant 0 : index
    %c0_4 = arith.constant 0 : index
    %3 = vector.load %arg4[%c0_3, %c0_4] : memref<5x32xf32, #tpu.memory_space<vmem>>, vector<1x32xf32>
    %4 = vector.broadcast %3 : vector<1x32xf32> to vector<16x32xf32>
    %5 = arith.addf %2, %4 : vector<16x32xf32>
    %cst_5 = arith.constant 0.000000e+00 : f32
    %6 = vector.broadcast %cst_5 : f32 to vector<16x32xf32>
    %7 = arith.maximumf %5, %6 : vector<16x32xf32>
    %c0_6 = arith.constant 0 : index
    %c0_7 = arith.constant 0 : index
    %c0_8 = arith.constant 0 : index
    %8 = vector.load %arg3[%c0_6, %c0_7, %c0_8] : memref<2x32x32xbf16, #tpu.memory_space<vmem>>, vector<1x32x32xbf16>
    %9 = vector.shape_cast %8 : vector<1x32x32xbf16> to vector<32x32xbf16>
    %10 = arith.truncf %7 : vector<16x32xf32> to vector<16x32xbf16>
    %cst_9 = arith.constant dense<0.000000e+00> : vector<16x32xf32>
    %11 = tpu.matmul %10, %9, %cst_9 {dimension_numbers = #tpu.dot_dimension_numbers<[1], [0], [0], [1], [0, 0, 1, 1], [], []>} : vector<16x32xbf16>, vector<32x32xbf16>, vector<16x32xf32> -> vector<16x32xf32>
    %c1 = arith.constant 1 : index
    %c0_10 = arith.constant 0 : index
    %12 = vector.load %arg4[%c1, %c0_10] : memref<5x32xf32, #tpu.memory_space<vmem>>, vector<1x32xf32>
    %13 = vector.broadcast %12 : vector<1x32xf32> to vector<16x32xf32>
    %14 = arith.addf %11, %13 : vector<16x32xf32>
    %cst_11 = arith.constant 0.000000e+00 : f32
    %15 = vector.broadcast %cst_11 : f32 to vector<16x32xf32>
    %16 = arith.maximumf %14, %15 : vector<16x32xf32>
    %c1_12 = arith.constant 1 : index
    %c0_13 = arith.constant 0 : index
    %c0_14 = arith.constant 0 : index
    %17 = vector.load %arg3[%c1_12, %c0_13, %c0_14] : memref<2x32x32xbf16, #tpu.memory_space<vmem>>, vector<1x32x32xbf16>
    %18 = vector.shape_cast %17 : vector<1x32x32xbf16> to vector<32x32xbf16>
    %19 = arith.truncf %16 : vector<16x32xf32> to vector<16x32xbf16>
    %cst_15 = arith.constant dense<0.000000e+00> : vector<16x32xf32>
    %20 = tpu.matmul %19, %18, %cst_15 {dimension_numbers = #tpu.dot_dimension_numbers<[1], [0], [0], [1], [0, 0, 1, 1], [], []>} : vector<16x32xbf16>, vector<32x32xbf16>, vector<16x32xf32> -> vector<16x32xf32>
    %c2 = arith.constant 2 : index
    %c0_16 = arith.constant 0 : index
    %21 = vector.load %arg4[%c2, %c0_16] : memref<5x32xf32, #tpu.memory_space<vmem>>, vector<1x32xf32>
    %22 = vector.broadcast %21 : vector<1x32xf32> to vector<16x32xf32>
    %23 = arith.addf %20, %22 : vector<16x32xf32>
    %cst_17 = arith.constant 0.000000e+00 : f32
    %24 = vector.broadcast %cst_17 : f32 to vector<16x32xf32>
    %25 = arith.maximumf %23, %24 : vector<16x32xf32>
    %c3 = arith.constant 3 : index
    %c0_18 = arith.constant 0 : index
    %26 = vector.load %arg4[%c3, %c0_18] : memref<5x32xf32, #tpu.memory_space<vmem>>, vector<1x32xf32>
    %c4 = arith.constant 4 : index
    %c0_19 = arith.constant 0 : index
    %27 = vector.load %arg4[%c4, %c0_19] : memref<5x32xf32, #tpu.memory_space<vmem>>, vector<1x32xf32>
    %cst_20 = arith.constant dense<0.000000e+00> : vector<16xf32>
    %28 = vector.multi_reduction <add>, %25, %cst_20 [1] : vector<16x32xf32> to vector<16xf32>
    %29 = vector.shape_cast %28 : vector<16xf32> to vector<16x1xf32>
    %cst_21 = arith.constant 3.200000e+01 : f32
    %30 = vector.broadcast %cst_21 : f32 to vector<16x1xf32>
    %31 = arith.divf %29, %30 : vector<16x1xf32>
    %32 = vector.broadcast %31 : vector<16x1xf32> to vector<16x32xf32>
    %33 = arith.subf %25, %32 : vector<16x32xf32>
    %34 = arith.mulf %33, %33 : vector<16x32xf32>
    %cst_22 = arith.constant dense<0.000000e+00> : vector<16xf32>
    %35 = vector.multi_reduction <add>, %34, %cst_22 [1] : vector<16x32xf32> to vector<16xf32>
    %36 = vector.shape_cast %35 : vector<16xf32> to vector<16x1xf32>
    %cst_23 = arith.constant 3.200000e+01 : f32
    %37 = vector.broadcast %cst_23 : f32 to vector<16x1xf32>
    %38 = arith.divf %36, %37 : vector<16x1xf32>
    %39 = vector.broadcast %31 : vector<16x1xf32> to vector<16x32xf32>
    %40 = arith.subf %25, %39 : vector<16x32xf32>
    %cst_24 = arith.constant 9.99999974E-6 : f32
    %41 = vector.broadcast %cst_24 : f32 to vector<16x1xf32>
    %42 = arith.addf %38, %41 : vector<16x1xf32>
    %43 = math.rsqrt %42 : vector<16x1xf32>
    %44 = vector.broadcast %43 : vector<16x1xf32> to vector<16x32xf32>
    %45 = arith.mulf %40, %44 : vector<16x32xf32>
    %46 = vector.broadcast %26 : vector<1x32xf32> to vector<16x32xf32>
    %47 = arith.mulf %45, %46 : vector<16x32xf32>
    %48 = vector.broadcast %27 : vector<1x32xf32> to vector<16x32xf32>
    %49 = arith.addf %47, %48 : vector<16x32xf32>
    %50 = arith.truncf %49 : vector<16x32xf32> to vector<16x32xbf16>
    %c0_25 = arith.constant 0 : index
    %c0_26 = arith.constant 0 : index
    %51 = vector.load %arg5[%c0_25, %c0_26] : memref<16x32xbf16, #tpu.memory_space<vmem>>, vector<16x32xbf16>
    tpu.vector_store %arg5[%c0_25, %c0_26], %50 {strides = array<i32>} : memref<16x32xbf16, #tpu.memory_space<vmem>>, vector<16x32xbf16>,
    return
  }
  func.func @transform_0(%arg0: i32) -> (i32, i32) {
    %c0_i32 = arith.constant 0 : i32
    %c0_i32_0 = arith.constant 0 : i32
    return %arg0, %c0_i32 : i32, i32
  }
  func.func @transform_1(%arg0: i32) -> (i32, i32) {
    %c0_i32 = arith.constant 0 : i32
    %c0_i32_0 = arith.constant 0 : i32
    %c0_i32_1 = arith.constant 0 : i32
    return %c0_i32, %c0_i32_0 : i32, i32
  }
  func.func @transform_2(%arg0: i32) -> (i32, i32, i32) {
    %c0_i32 = arith.constant 0 : i32
    %c0_i32_0 = arith.constant 0 : i32
    %c0_i32_1 = arith.constant 0 : i32
    %c0_i32_2 = arith.constant 0 : i32
    return %c0_i32, %c0_i32_0, %c0_i32_1 : i32, i32, i32
  }
  func.func @transform_3(%arg0: i32) -> (i32, i32) {
    %c0_i32 = arith.constant 0 : i32
    %c0_i32_0 = arith.constant 0 : i32
    %c0_i32_1 = arith.constant 0 : i32
    return %c0_i32, %c0_i32_0 : i32, i32
  }
  func.func @transform_4(%arg0: i32) -> (i32, i32) {
    %c0_i32 = arith.constant 0 : i32
    %c0_i32_0 = arith.constant 0 : i32
    return %arg0, %c0_i32 : i32, i32
  }
}

module attributes {stable_mosaic.version = 11 : i64} {
  func.func @kernel(%arg0: i32, %arg1: memref<1xf32, #tpu.memory_space<smem>>, %arg2: memref<8x32xbf16, #tpu.memory_space<vmem>>, %arg3: memref<8x32xbf16, #tpu.memory_space<vmem>>, %arg4: memref<32x32xbf16, #tpu.memory_space<vmem>>, %arg5: memref<2x32x32xbf16, #tpu.memory_space<vmem>>, %arg6: memref<3x32xf32, #tpu.memory_space<vmem>>, %arg7: memref<8x32xbf16, #tpu.memory_space<vmem>>) attributes {dimension_semantics = [#tpu.dimension_semantics<parallel>], iteration_bounds = array<i64: 2>, scalar_prefetch = 0 : i64, scratch_operands = 0 : i64, tpu.core_type = #tpu.core_type<tc>, window_params = [{transform_indices = @transform_0, window_bounds = array<i64: 1>}, {transform_indices = @transform_1, window_bounds = array<i64: 8, 32>}, {transform_indices = @transform_2, window_bounds = array<i64: 8, 32>}, {pipeline_mode = #tpu.pipeline_mode<synchronous>, transform_indices = @transform_3, window_bounds = array<i64: 32, 32>}, {pipeline_mode = #tpu.pipeline_mode<synchronous>, transform_indices = @transform_4, window_bounds = array<i64: 2, 32, 32>}, {pipeline_mode = #tpu.pipeline_mode<synchronous>, transform_indices = @transform_5, window_bounds = array<i64: 3, 32>}, {transform_indices = @transform_6, window_bounds = array<i64: 8, 32>}]} {
    %c0 = arith.constant 0 : index
    %0 = memref.load %arg1[%c0] : memref<1xf32, #tpu.memory_space<smem>>
    %cst = arith.constant 1.000000e+00 : f32
    %1 = arith.addf %cst, %0 : f32
    %c0_0 = arith.constant 0 : index
    %c0_1 = arith.constant 0 : index
    %2 = vector.load %arg2[%c0_0, %c0_1] : memref<8x32xbf16, #tpu.memory_space<vmem>>, vector<8x32xbf16>
    %3 = arith.extf %2 : vector<8x32xbf16> to vector<8x32xf32>
    %4 = vector.broadcast %1 : f32 to vector<8x32xf32>
    %5 = arith.mulf %4, %3 : vector<8x32xf32>
    %c0_2 = arith.constant 0 : index
    %c0_3 = arith.constant 0 : index
    %6 = vector.load %arg3[%c0_2, %c0_3] : memref<8x32xbf16, #tpu.memory_space<vmem>>, vector<8x32xbf16>
    %7 = arith.extf %6 : vector<8x32xbf16> to vector<8x32xf32>
    %8 = arith.addf %5, %7 : vector<8x32xf32>
    %c0_4 = arith.constant 0 : index
    %c0_5 = arith.constant 0 : index
    %9 = vector.load %arg4[%c0_4, %c0_5] : memref<32x32xbf16, #tpu.memory_space<vmem>>, vector<32x32xbf16>
    %10 = arith.truncf %8 : vector<8x32xf32> to vector<8x32xbf16>
    %cst_6 = arith.constant dense<0.000000e+00> : vector<8x32xf32>
    %11 = tpu.matmul %10, %9, %cst_6 {dimension_numbers = #tpu.dot_dimension_numbers<[1], [0], [0], [1], [0, 0, 1, 1], [], []>} : vector<8x32xbf16>, vector<32x32xbf16>, vector<8x32xf32> -> vector<8x32xf32>
    %c0_7 = arith.constant 0 : index
    %c0_8 = arith.constant 0 : index
    %12 = vector.load %arg6[%c0_7, %c0_8] : memref<3x32xf32, #tpu.memory_space<vmem>>, vector<1x32xf32>
    %13 = vector.broadcast %12 : vector<1x32xf32> to vector<8x32xf32>
    %14 = arith.addf %11, %13 : vector<8x32xf32>
    %cst_9 = arith.constant 0.000000e+00 : f32
    %15 = vector.broadcast %cst_9 : f32 to vector<8x32xf32>
    %16 = arith.maximumf %14, %15 : vector<8x32xf32>
    %c0_10 = arith.constant 0 : index
    %c0_11 = arith.constant 0 : index
    %c0_12 = arith.constant 0 : index
    %17 = vector.load %arg5[%c0_10, %c0_11, %c0_12] : memref<2x32x32xbf16, #tpu.memory_space<vmem>>, vector<1x32x32xbf16>
    %18 = vector.shape_cast %17 : vector<1x32x32xbf16> to vector<32x32xbf16>
    %19 = arith.truncf %16 : vector<8x32xf32> to vector<8x32xbf16>
    %cst_13 = arith.constant dense<0.000000e+00> : vector<8x32xf32>
    %20 = tpu.matmul %19, %18, %cst_13 {dimension_numbers = #tpu.dot_dimension_numbers<[1], [0], [0], [1], [0, 0, 1, 1], [], []>} : vector<8x32xbf16>, vector<32x32xbf16>, vector<8x32xf32> -> vector<8x32xf32>
    %c1 = arith.constant 1 : index
    %c0_14 = arith.constant 0 : index
    %21 = vector.load %arg6[%c1, %c0_14] : memref<3x32xf32, #tpu.memory_space<vmem>>, vector<1x32xf32>
    %22 = vector.broadcast %21 : vector<1x32xf32> to vector<8x32xf32>
    %23 = arith.addf %20, %22 : vector<8x32xf32>
    %cst_15 = arith.constant 0.000000e+00 : f32
    %24 = vector.broadcast %cst_15 : f32 to vector<8x32xf32>
    %25 = arith.maximumf %23, %24 : vector<8x32xf32>
    %c1_16 = arith.constant 1 : index
    %c0_17 = arith.constant 0 : index
    %c0_18 = arith.constant 0 : index
    %26 = vector.load %arg5[%c1_16, %c0_17, %c0_18] : memref<2x32x32xbf16, #tpu.memory_space<vmem>>, vector<1x32x32xbf16>
    %27 = vector.shape_cast %26 : vector<1x32x32xbf16> to vector<32x32xbf16>
    %28 = arith.truncf %25 : vector<8x32xf32> to vector<8x32xbf16>
    %cst_19 = arith.constant dense<0.000000e+00> : vector<8x32xf32>
    %29 = tpu.matmul %28, %27, %cst_19 {dimension_numbers = #tpu.dot_dimension_numbers<[1], [0], [0], [1], [0, 0, 1, 1], [], []>} : vector<8x32xbf16>, vector<32x32xbf16>, vector<8x32xf32> -> vector<8x32xf32>
    %c2 = arith.constant 2 : index
    %c0_20 = arith.constant 0 : index
    %30 = vector.load %arg6[%c2, %c0_20] : memref<3x32xf32, #tpu.memory_space<vmem>>, vector<1x32xf32>
    %31 = vector.broadcast %30 : vector<1x32xf32> to vector<8x32xf32>
    %32 = arith.addf %29, %31 : vector<8x32xf32>
    %cst_21 = arith.constant 0.000000e+00 : f32
    %33 = vector.broadcast %cst_21 : f32 to vector<8x32xf32>
    %34 = arith.maximumf %32, %33 : vector<8x32xf32>
    %35 = arith.truncf %34 : vector<8x32xf32> to vector<8x32xbf16>
    %c0_22 = arith.constant 0 : index
    %c0_23 = arith.constant 0 : index
    %36 = vector.load %arg7[%c0_22, %c0_23] : memref<8x32xbf16, #tpu.memory_space<vmem>>, vector<8x32xbf16>
    tpu.vector_store %arg7[%c0_22, %c0_23], %35 {strides = array<i32>} : memref<8x32xbf16, #tpu.memory_space<vmem>>, vector<8x32xbf16>,
    return
  }
  func.func @transform_0(%arg0: i32) -> i32 {
    %c0_i32 = arith.constant 0 : i32
    %c0_i32_0 = arith.constant 0 : i32
    return %c0_i32 : i32
  }
  func.func @transform_1(%arg0: i32) -> (i32, i32) {
    %c0_i32 = arith.constant 0 : i32
    %c0_i32_0 = arith.constant 0 : i32
    return %arg0, %c0_i32 : i32, i32
  }
  func.func @transform_2(%arg0: i32) -> (i32, i32) {
    %c0_i32 = arith.constant 0 : i32
    %c0_i32_0 = arith.constant 0 : i32
    return %arg0, %c0_i32 : i32, i32
  }
  func.func @transform_3(%arg0: i32) -> (i32, i32) {
    %c0_i32 = arith.constant 0 : i32
    %c0_i32_0 = arith.constant 0 : i32
    %c0_i32_1 = arith.constant 0 : i32
    return %c0_i32, %c0_i32_0 : i32, i32
  }
  func.func @transform_4(%arg0: i32) -> (i32, i32, i32) {
    %c0_i32 = arith.constant 0 : i32
    %c0_i32_0 = arith.constant 0 : i32
    %c0_i32_1 = arith.constant 0 : i32
    %c0_i32_2 = arith.constant 0 : i32
    return %c0_i32, %c0_i32_0, %c0_i32_1 : i32, i32, i32
  }
  func.func @transform_5(%arg0: i32) -> (i32, i32) {
    %c0_i32 = arith.constant 0 : i32
    %c0_i32_0 = arith.constant 0 : i32
    %c0_i32_1 = arith.constant 0 : i32
    return %c0_i32, %c0_i32_0 : i32, i32
  }
  func.func @transform_6(%arg0: i32) -> (i32, i32) {
    %c0_i32 = arith.constant 0 : i32
    %c0_i32_0 = arith.constant 0 : i32
    return %arg0, %c0_i32 : i32, i32
  }
}

module attributes {stable_mosaic.version = 11 : i64} {
  func.func @kernel(%arg0: i32, %arg1: memref<16x32xbf16, #tpu.memory_space<vmem>>, %arg2: memref<16x32xbf16, #tpu.memory_space<vmem>>, %arg3: memref<16x32xbf16, #tpu.memory_space<vmem>>, %arg4: memref<32x32xbf16, #tpu.memory_space<vmem>>, %arg5: memref<32x32xbf16, #tpu.memory_space<vmem>>, %arg6: memref<32x32xbf16, #tpu.memory_space<vmem>>, %arg7: memref<2x32x32xbf16, #tpu.memory_space<vmem>>, %arg8: memref<5x32xf32, #tpu.memory_space<vmem>>, %arg9: memref<16x32xbf16, #tpu.memory_space<vmem>>) attributes {dimension_semantics = [#tpu.dimension_semantics<parallel>], iteration_bounds = array<i64: 2>, scalar_prefetch = 0 : i64, scratch_operands = 0 : i64, tpu.core_type = #tpu.core_type<tc>, window_params = [{transform_indices = @transform_0, window_bounds = array<i64: 16, 32>}, {transform_indices = @transform_1, window_bounds = array<i64: 16, 32>}, {transform_indices = @transform_2, window_bounds = array<i64: 16, 32>}, {pipeline_mode = #tpu.pipeline_mode<synchronous>, transform_indices = @transform_3, window_bounds = array<i64: 32, 32>}, {pipeline_mode = #tpu.pipeline_mode<synchronous>, transform_indices = @transform_4, window_bounds = array<i64: 32, 32>}, {pipeline_mode = #tpu.pipeline_mode<synchronous>, transform_indices = @transform_5, window_bounds = array<i64: 32, 32>}, {pipeline_mode = #tpu.pipeline_mode<synchronous>, transform_indices = @transform_6, window_bounds = array<i64: 2, 32, 32>}, {pipeline_mode = #tpu.pipeline_mode<synchronous>, transform_indices = @transform_7, window_bounds = array<i64: 5, 32>}, {transform_indices = @transform_8, window_bounds = array<i64: 16, 32>}]} {
    %c0 = arith.constant 0 : index
    %c0_0 = arith.constant 0 : index
    %0 = vector.load %arg1[%c0, %c0_0] : memref<16x32xbf16, #tpu.memory_space<vmem>>, vector<16x32xbf16>
    %c0_1 = arith.constant 0 : index
    %c0_2 = arith.constant 0 : index
    %1 = vector.load %arg4[%c0_1, %c0_2] : memref<32x32xbf16, #tpu.memory_space<vmem>>, vector<32x32xbf16>
    %cst = arith.constant dense<0.000000e+00> : vector<16x32xf32>
    %2 = tpu.matmul %0, %1, %cst {dimension_numbers = #tpu.dot_dimension_numbers<[1], [0], [0], [1], [0, 0, 1, 1], [], []>} : vector<16x32xbf16>, vector<32x32xbf16>, vector<16x32xf32> -> vector<16x32xf32>
    %c0_3 = arith.constant 0 : index
    %c0_4 = arith.constant 0 : index
    %3 = vector.load %arg2[%c0_3, %c0_4] : memref<16x32xbf16, #tpu.memory_space<vmem>>, vector<16x32xbf16>
    %c0_5 = arith.constant 0 : index
    %c0_6 = arith.constant 0 : index
    %4 = vector.load %arg5[%c0_5, %c0_6] : memref<32x32xbf16, #tpu.memory_space<vmem>>, vector<32x32xbf16>
    %cst_7 = arith.constant dense<0.000000e+00> : vector<16x32xf32>
    %5 = tpu.matmul %3, %4, %cst_7 {dimension_numbers = #tpu.dot_dimension_numbers<[1], [0], [0], [1], [0, 0, 1, 1], [], []>} : vector<16x32xbf16>, vector<32x32xbf16>, vector<16x32xf32> -> vector<16x32xf32>
    %6 = arith.addf %2, %5 : vector<16x32xf32>
    %c0_8 = arith.constant 0 : index
    %c0_9 = arith.constant 0 : index
    %7 = vector.load %arg3[%c0_8, %c0_9] : memref<16x32xbf16, #tpu.memory_space<vmem>>, vector<16x32xbf16>
    %c0_10 = arith.constant 0 : index
    %c0_11 = arith.constant 0 : index
    %8 = vector.load %arg6[%c0_10, %c0_11] : memref<32x32xbf16, #tpu.memory_space<vmem>>, vector<32x32xbf16>
    %cst_12 = arith.constant dense<0.000000e+00> : vector<16x32xf32>
    %9 = tpu.matmul %7, %8, %cst_12 {dimension_numbers = #tpu.dot_dimension_numbers<[1], [0], [0], [1], [0, 0, 1, 1], [], []>} : vector<16x32xbf16>, vector<32x32xbf16>, vector<16x32xf32> -> vector<16x32xf32>
    %10 = arith.addf %6, %9 : vector<16x32xf32>
    %c0_13 = arith.constant 0 : index
    %c0_14 = arith.constant 0 : index
    %11 = vector.load %arg8[%c0_13, %c0_14] : memref<5x32xf32, #tpu.memory_space<vmem>>, vector<1x32xf32>
    %12 = vector.broadcast %11 : vector<1x32xf32> to vector<16x32xf32>
    %13 = arith.addf %10, %12 : vector<16x32xf32>
    %cst_15 = arith.constant 0.000000e+00 : f32
    %14 = vector.broadcast %cst_15 : f32 to vector<16x32xf32>
    %15 = arith.maximumf %13, %14 : vector<16x32xf32>
    %c0_16 = arith.constant 0 : index
    %c0_17 = arith.constant 0 : index
    %c0_18 = arith.constant 0 : index
    %16 = vector.load %arg7[%c0_16, %c0_17, %c0_18] : memref<2x32x32xbf16, #tpu.memory_space<vmem>>, vector<1x32x32xbf16>
    %17 = vector.shape_cast %16 : vector<1x32x32xbf16> to vector<32x32xbf16>
    %18 = arith.truncf %15 : vector<16x32xf32> to vector<16x32xbf16>
    %cst_19 = arith.constant dense<0.000000e+00> : vector<16x32xf32>
    %19 = tpu.matmul %18, %17, %cst_19 {dimension_numbers = #tpu.dot_dimension_numbers<[1], [0], [0], [1], [0, 0, 1, 1], [], []>} : vector<16x32xbf16>, vector<32x32xbf16>, vector<16x32xf32> -> vector<16x32xf32>
    %c1 = arith.constant 1 : index
    %c0_20 = arith.constant 0 : index
    %20 = vector.load %arg8[%c1, %c0_20] : memref<5x32xf32, #tpu.memory_space<vmem>>, vector<1x32xf32>
    %21 = vector.broadcast %20 : vector<1x32xf32> to vector<16x32xf32>
    %22 = arith.addf %19, %21 : vector<16x32xf32>
    %cst_21 = arith.constant 0.000000e+00 : f32
    %23 = vector.broadcast %cst_21 : f32 to vector<16x32xf32>
    %24 = arith.maximumf %22, %23 : vector<16x32xf32>
    %c1_22 = arith.constant 1 : index
    %c0_23 = arith.constant 0 : index
    %c0_24 = arith.constant 0 : index
    %25 = vector.load %arg7[%c1_22, %c0_23, %c0_24] : memref<2x32x32xbf16, #tpu.memory_space<vmem>>, vector<1x32x32xbf16>
    %26 = vector.shape_cast %25 : vector<1x32x32xbf16> to vector<32x32xbf16>
    %27 = arith.truncf %24 : vector<16x32xf32> to vector<16x32xbf16>
    %cst_25 = arith.constant dense<0.000000e+00> : vector<16x32xf32>
    %28 = tpu.matmul %27, %26, %cst_25 {dimension_numbers = #tpu.dot_dimension_numbers<[1], [0], [0], [1], [0, 0, 1, 1], [], []>} : vector<16x32xbf16>, vector<32x32xbf16>, vector<16x32xf32> -> vector<16x32xf32>
    %c2 = arith.constant 2 : index
    %c0_26 = arith.constant 0 : index
    %29 = vector.load %arg8[%c2, %c0_26] : memref<5x32xf32, #tpu.memory_space<vmem>>, vector<1x32xf32>
    %30 = vector.broadcast %29 : vector<1x32xf32> to vector<16x32xf32>
    %31 = arith.addf %28, %30 : vector<16x32xf32>
    %c3 = arith.constant 3 : index
    %c0_27 = arith.constant 0 : index
    %32 = vector.load %arg8[%c3, %c0_27] : memref<5x32xf32, #tpu.memory_space<vmem>>, vector<1x32xf32>
    %c4 = arith.constant 4 : index
    %c0_28 = arith.constant 0 : index
    %33 = vector.load %arg8[%c4, %c0_28] : memref<5x32xf32, #tpu.memory_space<vmem>>, vector<1x32xf32>
    %cst_29 = arith.constant dense<0.000000e+00> : vector<16xf32>
    %34 = vector.multi_reduction <add>, %31, %cst_29 [1] : vector<16x32xf32> to vector<16xf32>
    %35 = vector.shape_cast %34 : vector<16xf32> to vector<16x1xf32>
    %cst_30 = arith.constant 3.200000e+01 : f32
    %36 = vector.broadcast %cst_30 : f32 to vector<16x1xf32>
    %37 = arith.divf %35, %36 : vector<16x1xf32>
    %38 = vector.broadcast %37 : vector<16x1xf32> to vector<16x32xf32>
    %39 = arith.subf %31, %38 : vector<16x32xf32>
    %40 = arith.mulf %39, %39 : vector<16x32xf32>
    %cst_31 = arith.constant dense<0.000000e+00> : vector<16xf32>
    %41 = vector.multi_reduction <add>, %40, %cst_31 [1] : vector<16x32xf32> to vector<16xf32>
    %42 = vector.shape_cast %41 : vector<16xf32> to vector<16x1xf32>
    %cst_32 = arith.constant 3.200000e+01 : f32
    %43 = vector.broadcast %cst_32 : f32 to vector<16x1xf32>
    %44 = arith.divf %42, %43 : vector<16x1xf32>
    %45 = vector.broadcast %37 : vector<16x1xf32> to vector<16x32xf32>
    %46 = arith.subf %31, %45 : vector<16x32xf32>
    %cst_33 = arith.constant 9.99999974E-6 : f32
    %47 = vector.broadcast %cst_33 : f32 to vector<16x1xf32>
    %48 = arith.addf %44, %47 : vector<16x1xf32>
    %49 = math.rsqrt %48 : vector<16x1xf32>
    %50 = vector.broadcast %49 : vector<16x1xf32> to vector<16x32xf32>
    %51 = arith.mulf %46, %50 : vector<16x32xf32>
    %52 = vector.broadcast %32 : vector<1x32xf32> to vector<16x32xf32>
    %53 = arith.mulf %51, %52 : vector<16x32xf32>
    %54 = vector.broadcast %33 : vector<1x32xf32> to vector<16x32xf32>
    %55 = arith.addf %53, %54 : vector<16x32xf32>
    %56 = arith.truncf %55 : vector<16x32xf32> to vector<16x32xbf16>
    %c0_34 = arith.constant 0 : index
    %c0_35 = arith.constant 0 : index
    %57 = vector.load %arg9[%c0_34, %c0_35] : memref<16x32xbf16, #tpu.memory_space<vmem>>, vector<16x32xbf16>
    tpu.vector_store %arg9[%c0_34, %c0_35], %56 {strides = array<i32>} : memref<16x32xbf16, #tpu.memory_space<vmem>>, vector<16x32xbf16>,
    return
  }
  func.func @transform_0(%arg0: i32) -> (i32, i32) {
    %c0_i32 = arith.constant 0 : i32
    %c0_i32_0 = arith.constant 0 : i32
    return %arg0, %c0_i32 : i32, i32
  }
  func.func @transform_1(%arg0: i32) -> (i32, i32) {
    %c0_i32 = arith.constant 0 : i32
    %c0_i32_0 = arith.constant 0 : i32
    return %arg0, %c0_i32 : i32, i32
  }
  func.func @transform_2(%arg0: i32) -> (i32, i32) {
    %c0_i32 = arith.constant 0 : i32
    %c0_i32_0 = arith.constant 0 : i32
    return %arg0, %c0_i32 : i32, i32
  }
  func.func @transform_3(%arg0: i32) -> (i32, i32) {
    %c0_i32 = arith.constant 0 : i32
    %c0_i32_0 = arith.constant 0 : i32
    %c0_i32_1 = arith.constant 0 : i32
    return %c0_i32, %c0_i32_0 : i32, i32
  }
  func.func @transform_4(%arg0: i32) -> (i32, i32) {
    %c0_i32 = arith.constant 0 : i32
    %c0_i32_0 = arith.constant 0 : i32
    %c0_i32_1 = arith.constant 0 : i32
    return %c0_i32, %c0_i32_0 : i32, i32
  }
  func.func @transform_5(%arg0: i32) -> (i32, i32) {
    %c0_i32 = arith.constant 0 : i32
    %c0_i32_0 = arith.constant 0 : i32
    %c0_i32_1 = arith.constant 0 : i32
    return %c0_i32, %c0_i32_0 : i32, i32
  }
  func.func @transform_6(%arg0: i32) -> (i32, i32, i32) {
    %c0_i32 = arith.constant 0 : i32
    %c0_i32_0 = arith.constant 0 : i32
    %c0_i32_1 = arith.constant 0 : i32
    %c0_i32_2 = arith.constant 0 : i32
    return %c0_i32, %c0_i32_0, %c0_i32_1 : i32, i32, i32
  }
  func.func @transform_7(%arg0: i32) -> (i32, i32) {
    %c0_i32 = arith.constant 0 : i32
    %c0_i32_0 = arith.constant 0 : i32
    %c0_i32_1 = arith.constant 0 : i32
    return %c0_i32, %c0_i32_0 : i32, i32
  }
  func.func @transform_8(%arg0: i32) -> (i32, i32) {
    %c0_i32 = arith.constant 0 : i32
    %c0_i32_0 = arith.constant 0 : i32
    return %arg0, %c0_i32 : i32, i32
  }
}

module attributes {stable_mosaic.version = 11 : i64} {
  func.func @_out_head_kernel(%arg0: i32, %arg1: memref<1xf32, #tpu.memory_space<smem>>, %arg2: memref<16x32xbf16, #tpu.memory_space<vmem>>, %arg3: memref<16x32xbf16, #tpu.memory_space<vmem>>, %arg4: memref<16x32xbf16, #tpu.memory_space<vmem>>, %arg5: memref<3x32x32xbf16, #tpu.memory_space<vmem>>, %arg6: memref<3x32xf32, #tpu.memory_space<vmem>>, %arg7: memref<1x32xf32, #tpu.memory_space<vmem>>, %arg8: memref<16x1xf32, #tpu.memory_space<vmem>>) attributes {dimension_semantics = [#tpu.dimension_semantics<parallel>], iteration_bounds = array<i64: 2>, scalar_prefetch = 0 : i64, scratch_operands = 0 : i64, tpu.core_type = #tpu.core_type<tc>, window_params = [{transform_indices = @transform_0, window_bounds = array<i64: 1>}, {transform_indices = @transform_1, window_bounds = array<i64: 16, 32>}, {transform_indices = @transform_2, window_bounds = array<i64: 16, 32>}, {transform_indices = @transform_3, window_bounds = array<i64: 16, 32>}, {pipeline_mode = #tpu.pipeline_mode<synchronous>, transform_indices = @transform_4, window_bounds = array<i64: 3, 32, 32>}, {pipeline_mode = #tpu.pipeline_mode<synchronous>, transform_indices = @transform_5, window_bounds = array<i64: 3, 32>}, {pipeline_mode = #tpu.pipeline_mode<synchronous>, transform_indices = @transform_6, window_bounds = array<i64: 1, 32>}, {transform_indices = @transform_7, window_bounds = array<i64: 16, 1>}]} {
    %c0 = arith.constant 0 : index
    %c0_0 = arith.constant 0 : index
    %0 = vector.load %arg2[%c0, %c0_0] : memref<16x32xbf16, #tpu.memory_space<vmem>>, vector<16x32xbf16>
    %c0_1 = arith.constant 0 : index
    %c0_2 = arith.constant 0 : index
    %c0_3 = arith.constant 0 : index
    %1 = vector.load %arg5[%c0_1, %c0_2, %c0_3] : memref<3x32x32xbf16, #tpu.memory_space<vmem>>, vector<1x32x32xbf16>
    %2 = vector.shape_cast %1 : vector<1x32x32xbf16> to vector<32x32xbf16>
    %cst = arith.constant dense<0.000000e+00> : vector<16x32xf32>
    %3 = tpu.matmul %0, %2, %cst {dimension_numbers = #tpu.dot_dimension_numbers<[1], [0], [0], [1], [0, 0, 1, 1], [], []>} : vector<16x32xbf16>, vector<32x32xbf16>, vector<16x32xf32> -> vector<16x32xf32>
    %c0_4 = arith.constant 0 : index
    %c0_5 = arith.constant 0 : index
    %4 = vector.load %arg3[%c0_4, %c0_5] : memref<16x32xbf16, #tpu.memory_space<vmem>>, vector<16x32xbf16>
    %c1 = arith.constant 1 : index
    %c0_6 = arith.constant 0 : index
    %c0_7 = arith.constant 0 : index
    %5 = vector.load %arg5[%c1, %c0_6, %c0_7] : memref<3x32x32xbf16, #tpu.memory_space<vmem>>, vector<1x32x32xbf16>
    %6 = vector.shape_cast %5 : vector<1x32x32xbf16> to vector<32x32xbf16>
    %cst_8 = arith.constant dense<0.000000e+00> : vector<16x32xf32>
    %7 = tpu.matmul %4, %6, %cst_8 {dimension_numbers = #tpu.dot_dimension_numbers<[1], [0], [0], [1], [0, 0, 1, 1], [], []>} : vector<16x32xbf16>, vector<32x32xbf16>, vector<16x32xf32> -> vector<16x32xf32>
    %8 = arith.addf %3, %7 : vector<16x32xf32>
    %c0_9 = arith.constant 0 : index
    %c0_10 = arith.constant 0 : index
    %9 = vector.load %arg4[%c0_9, %c0_10] : memref<16x32xbf16, #tpu.memory_space<vmem>>, vector<16x32xbf16>
    %c2 = arith.constant 2 : index
    %c0_11 = arith.constant 0 : index
    %c0_12 = arith.constant 0 : index
    %10 = vector.load %arg5[%c2, %c0_11, %c0_12] : memref<3x32x32xbf16, #tpu.memory_space<vmem>>, vector<1x32x32xbf16>
    %11 = vector.shape_cast %10 : vector<1x32x32xbf16> to vector<32x32xbf16>
    %cst_13 = arith.constant dense<0.000000e+00> : vector<16x32xf32>
    %12 = tpu.matmul %9, %11, %cst_13 {dimension_numbers = #tpu.dot_dimension_numbers<[1], [0], [0], [1], [0, 0, 1, 1], [], []>} : vector<16x32xbf16>, vector<32x32xbf16>, vector<16x32xf32> -> vector<16x32xf32>
    %13 = arith.addf %8, %12 : vector<16x32xf32>
    %c0_14 = arith.constant 0 : index
    %c0_15 = arith.constant 0 : index
    %14 = vector.load %arg6[%c0_14, %c0_15] : memref<3x32xf32, #tpu.memory_space<vmem>>, vector<1x32xf32>
    %15 = vector.broadcast %14 : vector<1x32xf32> to vector<16x32xf32>
    %16 = arith.addf %13, %15 : vector<16x32xf32>
    %cst_16 = arith.constant 0.000000e+00 : f32
    %17 = vector.broadcast %cst_16 : f32 to vector<16x32xf32>
    %18 = arith.maximumf %16, %17 : vector<16x32xf32>
    %cst_17 = arith.constant dense<0.000000e+00> : vector<16xf32>
    %19 = vector.multi_reduction <add>, %18, %cst_17 [1] : vector<16x32xf32> to vector<16xf32>
    %20 = vector.shape_cast %19 : vector<16xf32> to vector<16x1xf32>
    %cst_18 = arith.constant 3.200000e+01 : f32
    %21 = vector.broadcast %cst_18 : f32 to vector<16x1xf32>
    %22 = arith.divf %20, %21 : vector<16x1xf32>
    %23 = vector.broadcast %22 : vector<16x1xf32> to vector<16x32xf32>
    %24 = arith.subf %18, %23 : vector<16x32xf32>
    %25 = arith.mulf %24, %24 : vector<16x32xf32>
    %cst_19 = arith.constant dense<0.000000e+00> : vector<16xf32>
    %26 = vector.multi_reduction <add>, %25, %cst_19 [1] : vector<16x32xf32> to vector<16xf32>
    %27 = vector.shape_cast %26 : vector<16xf32> to vector<16x1xf32>
    %cst_20 = arith.constant 3.200000e+01 : f32
    %28 = vector.broadcast %cst_20 : f32 to vector<16x1xf32>
    %29 = arith.divf %27, %28 : vector<16x1xf32>
    %30 = vector.broadcast %22 : vector<16x1xf32> to vector<16x32xf32>
    %31 = arith.subf %18, %30 : vector<16x32xf32>
    %cst_21 = arith.constant 9.99999974E-6 : f32
    %32 = vector.broadcast %cst_21 : f32 to vector<16x1xf32>
    %33 = arith.addf %29, %32 : vector<16x1xf32>
    %34 = math.rsqrt %33 : vector<16x1xf32>
    %35 = vector.broadcast %34 : vector<16x1xf32> to vector<16x32xf32>
    %36 = arith.mulf %31, %35 : vector<16x32xf32>
    %c1_22 = arith.constant 1 : index
    %c0_23 = arith.constant 0 : index
    %37 = vector.load %arg6[%c1_22, %c0_23] : memref<3x32xf32, #tpu.memory_space<vmem>>, vector<1x32xf32>
    %38 = vector.broadcast %37 : vector<1x32xf32> to vector<16x32xf32>
    %39 = arith.mulf %36, %38 : vector<16x32xf32>
    %c2_24 = arith.constant 2 : index
    %c0_25 = arith.constant 0 : index
    %40 = vector.load %arg6[%c2_24, %c0_25] : memref<3x32xf32, #tpu.memory_space<vmem>>, vector<1x32xf32>
    %41 = vector.broadcast %40 : vector<1x32xf32> to vector<16x32xf32>
    %42 = arith.addf %39, %41 : vector<16x32xf32>
    %c0_26 = arith.constant 0 : index
    %c0_27 = arith.constant 0 : index
    %43 = vector.load %arg7[%c0_26, %c0_27] : memref<1x32xf32, #tpu.memory_space<vmem>>, vector<1x32xf32>
    %44 = vector.broadcast %43 : vector<1x32xf32> to vector<16x32xf32>
    %45 = arith.mulf %42, %44 : vector<16x32xf32>
    %cst_28 = arith.constant dense<0.000000e+00> : vector<16xf32>
    %46 = vector.multi_reduction <add>, %45, %cst_28 [1] : vector<16x32xf32> to vector<16xf32>
    %47 = vector.shape_cast %46 : vector<16xf32> to vector<16x1xf32>
    %c0_29 = arith.constant 0 : index
    %48 = memref.load %arg1[%c0_29] : memref<1xf32, #tpu.memory_space<smem>>
    %49 = vector.broadcast %48 : f32 to vector<16x1xf32>
    %50 = arith.addf %47, %49 : vector<16x1xf32>
    %c0_30 = arith.constant 0 : index
    %c0_31 = arith.constant 0 : index
    %51 = vector.load %arg8[%c0_30, %c0_31] : memref<16x1xf32, #tpu.memory_space<vmem>>, vector<16x1xf32>
    tpu.vector_store %arg8[%c0_30, %c0_31], %50 {strides = array<i32>} : memref<16x1xf32, #tpu.memory_space<vmem>>, vector<16x1xf32>,
    return
  }
  func.func @transform_0(%arg0: i32) -> i32 {
    %c0_i32 = arith.constant 0 : i32
    %c0_i32_0 = arith.constant 0 : i32
    return %c0_i32 : i32
  }
  func.func @transform_1(%arg0: i32) -> (i32, i32) {
    %c0_i32 = arith.constant 0 : i32
    %c0_i32_0 = arith.constant 0 : i32
    return %arg0, %c0_i32 : i32, i32
  }
  func.func @transform_2(%arg0: i32) -> (i32, i32) {
    %c0_i32 = arith.constant 0 : i32
    %c0_i32_0 = arith.constant 0 : i32
    return %arg0, %c0_i32 : i32, i32
  }
  func.func @transform_3(%arg0: i32) -> (i32, i32) {
    %c0_i32 = arith.constant 0 : i32
    %c0_i32_0 = arith.constant 0 : i32
    return %arg0, %c0_i32 : i32, i32
  }
  func.func @transform_4(%arg0: i32) -> (i32, i32, i32) {
    %c0_i32 = arith.constant 0 : i32
    %c0_i32_0 = arith.constant 0 : i32
    %c0_i32_1 = arith.constant 0 : i32
    %c0_i32_2 = arith.constant 0 : i32
    return %c0_i32, %c0_i32_0, %c0_i32_1 : i32, i32, i32
  }
  func.func @transform_5(%arg0: i32) -> (i32, i32) {
    %c0_i32 = arith.constant 0 : i32
    %c0_i32_0 = arith.constant 0 : i32
    %c0_i32_1 = arith.constant 0 : i32
    return %c0_i32, %c0_i32_0 : i32, i32
  }
  func.func @transform_6(%arg0: i32) -> (i32, i32) {
    %c0_i32 = arith.constant 0 : i32
    %c0_i32_0 = arith.constant 0 : i32
    %c0_i32_1 = arith.constant 0 : i32
    return %c0_i32, %c0_i32_0 : i32, i32
  }
  func.func @transform_7(%arg0: i32) -> (i32, i32) {
    %c0_i32 = arith.constant 0 : i32
    %c0_i32_0 = arith.constant 0 : i32
    return %arg0, %c0_i32 : i32, i32
  }
}

</mosaic_0001>

<bundles_post_ra>
// kernel: net_forward.10
= control target key start
LH: loop header
LB: loop body
LE: loop exit
PB: predicated region body
PF: predicated region fallthrough
CT: control target
= control target key end

     0   :  { %s883_s15 = smov 0   ;;  %s885_s16 = smov 0   ;;  %s990_s0 = inlined_call_operand.vmem [shape: bf16[24,16], index: 0, kind: input, shape index: {}]   ;;  %s991_s1 = inlined_call_operand.vmem [shape: bf16[16,16], index: 1, kind: input, shape index: {}]   ;;  %s992_s2 = inlined_call_operand.vmem [shape: bf16[1,16,16], index: 2, kind: input, shape index: {}]   ;;  %s993_s3 = inlined_call_operand.vmem [shape: f32[4,16], index: 3, kind: input, shape index: {}]   ;;  %s994_s4 = inlined_call_operand.vmem [shape: bf16[24,16], index: 4, kind: output, shape index: {}]  }
   0x1   :  { %s887_s17 = smov 0  }
   0x2 LB: > { %s896_s18 = sadd.s32 4294967295, %s822_s17   ;;  %s898_s19 = sadd.s32 1, %s822_s17   ;;  %s822_s17 = sphi %s887_s17, %s998_s17   ;;  %s818_s16 = sphi %s885_s16, %s997_s16   ;;  %s814_s15 = sphi %s883_s15, %s996_s15  }
   0x3   : > { %s107_s20 = ssub.s32 %s822_s17, %s898_s19  ;;  %s110_s21 = sadd.s32 1, %s818_s16 }
   0x4   : > { %p108_p0 = scmp.eq.s32.totalorder %s107_s20, 0  ;;  %p120_p1 = scmp.ne.s32.totalorder %s818_s16, %s814_s15 }
   0x5   : > { %p121_p2 = scmp.eq.s32.totalorder %s896_s18, 1  ;;  %p618_p3 = scmp.ge.s32.totalorder %s822_s17, 1 }
   0x6   : > { %s906_s22 = scalar_select %p108_p0, %s818_s16, %s110_s21  }
   0x7   : > { %p908_p4 = por %p121_p2, %p120_p1  ;;  %p171_p5 = scmp.lt.s32.totalorder %s822_s17, 3 }
   0x9   : > { %p172_p6 = pnand %p618_p3, %p171_p5 }
   0xa   : > { %v761_v0 = vld [vmem:[%s991_s1] sm:$0xff] (!%p172_p6)   ;;  %v856_v1 = vmov (!%p172_p6), 0.0   ;;  %s916_s26 = sshll.u32 (!%p172_p6), %s896_s18, 1  ;;  %vm857_vm0 = vmmov (!%p172_p6), 0   ;;  %vm240_vm1 = vcmask (!%p172_p6), 130048   ;;  %s197_s14 = sand.u32 (!%p172_p6), 1, %s814_s15  }
   0xb   : > { %175 = sbr.rel (%p172_p6) target bundleno = 826 (0x33a), region = 36  ;;  %659 = vmatprep.subr.bf16.mxu0 (!%p172_p6), %v856_v1  ;;  %665 = vmatprep.subr.bf16.mxu1 (!%p172_p6), %v856_v1  ;;  %p205_p7 = scmp.lt.s32.totalorder (!%p172_p6), %s916_s26, 2  ;;  %v763_v3 = vld [vmem:[%s992_s2] sm:$0xff] (!%p172_p6)   ;;  %vm394_vm2 = vcmask (!%p172_p6), 125952  }
   0xc   : > { %660 = vmatpush3.bf16.msra.mxu0 (!%p172_p6), %v761_v0  ;;  %661 = vmatprep.mubr.msk.bf16.mxu0 (!%p172_p6), %vm857_vm0, %v856_v1  ;;  %v622_v4 = vld [vmem:[%s993_s3] ss:$0 sm:$0xff] (!%p172_p6)  ;;  %v626_v14 = vld [vmem:[%s993_s3 + $0x1] ss:$0 sm:$0xff] (!%p172_p6)  ;;  %v629_v40 = vld [vmem:[%s993_s3 + $0x2] ss:$0 sm:$0xff] (!%p172_p6) }
   0xd   : > { %667 = vmatprep.mubr.msk.bf16.mxu1 (!%p172_p6), %vm857_vm0, %v856_v1  ;;  %666 = vmatpush3.bf16.msra.mxu1 (!%p172_p6), %v763_v3  ;;  %v630_v42 = vld [vmem:[%s993_s3 + $0x3] ss:$0 sm:$0xff] (!%p172_p6)  ;;  %s619_s21 = sshll.u32 (!%p172_p6), %s197_s14, 3 }
   0xe   : > { %s945_s24 = scalar_lea.vmem (!%p172_p6), [#allocation2], %s619_s21  }
  0x12   : > { %s206_s27 = scalar_select %p205_p7, %s916_s26, 2 }
  0x13   : > { %s405_s15 = ssub.s32 (%p908_p4), 3, %s916_s26  ;;  %s652_s25 = sshll.u32 (%p908_p4), %s896_s18, 3 }
  0x14   : > { %s621_s28 = sshll.u32 %s206_s27, 2  ;;  %p406_p8 = scmp.lt.s32.totalorder (%p908_p4), %s405_s15, 2 }
  0x15   : > { %s208_s5 = scalar_lea.vmem %s990_s0, %s621_s28  ;;  %s956_s29 = scalar_lea.vmem (%p908_p4), %s994_s4, %s652_s25  }
  0x16   : > { %v762_v2 = vld [vmem:[%s208_s5] sm:$0xff]  }
  0x17   : > { %662 = vmatmul.mubr.msk.bf16.vlgmr.msra.gmra.mrb[0].mxu0 %vm240_vm1, %v762_v2 }
  0xea   : > { %v278_v5 = vpop.f32.mrb[0].mxu0 }
  0xeb   : > { %v279_v6 = vadd.f32 %v622_v4, %v278_v5  ;;  %v663_v7 = vpop.f32.mrb[1].mxu0 }
  0xec   : > { %v281_v8 = vpop.f32.mrb[2].mxu0 }
  0xed   : > { %v282_v9 = vadd.f32 %v622_v4, %v281_v8  ;;  %v664_v10 = vpop.f32.mrb[3].mxu0  ;;  %v285_v11 = vmax.f32 %v279_v6, 0.0 }
  0xef   : > { %v286_v12 = vmax.f32 %v282_v9, 0.0 }
  0xf1   : > { %v289_v13 = vpack.c.bf16 %v286_v12, %v285_v11 }
  0xf3   : > { %668 = vmatmul.mubr.msk.bf16.vlgmr.msra.gmra.mrb[0].mxu1 %vm240_vm1, %v289_v13 }
 0x1c6   : > { %v338_v15 = vpop.f32.mrb[0].mxu1 }
 0x1c7   : > { %v339_v16 = vadd.f32 %v626_v14, %v338_v15  ;;  %v669_v17 = vpop.f32.mrb[1].mxu1 }
 0x1c8   : > { %v341_v18 = vpop.f32.mrb[2].mxu1 }
 0x1c9   : > { %v342_v19 = vadd.f32 %v626_v14, %v341_v18  ;;  %v670_v20 = vpop.f32.mrb[3].mxu1  ;;  %v347_v21 = vsel %vm240_vm1, %v339_v16, 0.0 }
 0x1ca   : > { %348 = vadd.xlane.f32.xlu0 %v347_v21 }
 0x1cb   : > { %v350_v22 = vsel %vm240_vm1, %v342_v19, 0.0 }
 0x1ce   : > { %351 = vadd.xlane.f32.xlu0 %v350_v22 }
 0x257   : > { %v349_v23 = vpop.xlane.xlu0 %348 }
 0x258   : > { %v354_v24 = vmul.f32 0.0625, %v349_v23 }
 0x25a   : > { %v356_v25 = vsub.f32 %v339_v16, %v354_v24 }
 0x25b   : > { %v352_v26 = vpop.xlane.xlu0 %351 }
 0x25c   : > { %v355_v27 = vmul.f32 0.0625, %v352_v26  ;;  %v358_v28 = vmul.f32 %v356_v25, %v356_v25 }
 0x25e   : > { %v357_v29 = vsub.f32 %v342_v19, %v355_v27  ;;  %v360_v30 = vsel %vm240_vm1, %v358_v28, 0.0 }
 0x25f   : > { %361 = vadd.xlane.f32.xlu1 %v360_v30 }
 0x260   : > { %v359_v31 = vmul.f32 %v357_v29, %v357_v29 }
 0x262   : > { %v363_v32 = vsel %vm240_vm1, %v359_v31, 0.0 }
 0x263   : > { %364 = vadd.xlane.f32.xlu1 %v363_v32 }
 0x2ec   : > { %v362_v33 = vpop.xlane.xlu1 %361 }
 0x2ed   : > { %v366_v34 = vmul.f32 0.0625, %v362_v33 }
 0x2ef   : > { %v368_v35 = vadd.f32 1e-05, %v366_v34 }
 0x2f0   : > { %v365_v36 = vpop.xlane.xlu1 %364 }
 0x2f1   : > { %764 = vrsqrt.f32 %v368_v35  ;;  %v367_v37 = vmul.f32 0.0625, %v365_v36 }
 0x2f3   : > { %v369_v38 = vadd.f32 1e-05, %v367_v37 }
 0x2f5   : > { %766 = vrsqrt.f32 %v369_v38 }
 0x2fb   : > { %v765_v39 = vpop.eup %764 }
 0x2fc   : > { %v372_v41 = vmul.f32 %v765_v39, %v356_v25 }
 0x2fe   : > { %v378_v43 = vmul.f32 %v629_v40, %v372_v41 }
 0x2ff   : > { %v767_v44 = vpop.eup %766 }
 0x300   : > { %v384_v45 = vadd.f32 %v630_v42, %v378_v43  ;;  %v373_v46 = vmul.f32 %v767_v44, %v357_v29 }
 0x302   : > { %v650_v47 = vpack.c.bf16 %v384_v45, %v384_v45  ;;  %v379_v48 = vmul.f32 %v629_v40, %v373_v46  ;;  %403 = sbr.rel (!%p908_p4) target bundleno = 826 (0x33a), region = 40 }
 0x304   : > { %395 = vst.msk [vmem:[%s945_s24] sm:$0xf] %vm394_vm2, %v650_v47  ;;  %v385_v49 = vadd.f32 %v630_v42, %v379_v48 }
 0x306   : > { %v651_v50 = vpack.c.bf16 %v385_v49, %v385_v49 }
 0x308   : > { %396 = vst.msk [vmem:[%s945_s24 + $0x4] sm:$0xf] %vm394_vm2, %v651_v50 }
 0x309   : > { %s1000_s15 = smov (!%p406_p8, %s405_s15), 2 }
 0x30a   : > { %s635_s30 = sshll.u32 %s1000_s15, 6 }
 0x30b   : > { %p638_p9 = scmp.eq.s32.totalorder %s635_s30, 0 }
 0x30c   : > { %s962_s5 = sshrl.u32 (!%p638_p9), %s1000_s15, 1 }
 0x30d   : > { %414 = sbr.rel (%p638_p9) target bundleno = 826 (0x33a), region = 44  ;;  %p639_p10 = scmp.le.s32.totalorder (!%p638_p9), %s962_s5, 0 }
 0x314   : > { %571 = sbr.rel (%p639_p10) target bundleno = 805 (0x325), region = 116  ;;  %s824_s18 = smov (!%p639_p10), %s956_s29  }
 0x315   : > { %s828_s23 = smov (!%p639_p10), %s945_s24   ;;  %s832_s26 = smov (!%p639_p10), 0  }
 0x316   : > { %s836_s6 = smov (!%p639_p10), 0  }
 0x31b LB: >> { %v430_v51 = vld [vmem:[%s830_s23] sm:$0xf]  ;;  %v432_v52 = vld [vmem:[%s830_s23 + $0x4] sm:$0xf]  ;;  %s434_s7 = sadd.s32 1, %s834_s26  ;;  %s424_s6 = sadd.s32 1, %s838_s6   ;;  %s838_s6 = sphi %s836_s6, %s424_s6   ;;  %s834_s26 = sphi %s832_s26, %s833_s26   ;;  %s830_s23 = sphi %s828_s23, %s439_s23   ;;  %s826_s18 = sphi %s824_s18, %s440_s18  }
 0x31c   : >> { %431 = vst [vmem:[%s826_s18] sm:$0xf] %v430_v51  ;;  %433 = vst [vmem:[%s826_s18 + $0x4] sm:$0xf] %v432_v52  ;;  %p435_p11 = scmp.ge.s32.totalorder %s434_s7, %s962_s5  ;;  %p423_p12 = scmp.ge.s32.totalorder %s424_s6, %s962_s5 }
 0x31e   : >> { %s1002_s7 = smov (%p435_p11, %s434_s7), 0  ;;  %426 = sbr.rel (!%p423_p12) target bundleno = 795 (0x31b), region = 122 }
 0x31f   : >> { %s640_s8 = sshll.u32 %s1002_s7, 3  ;;  %s833_s26 = smov %s1002_s7  }
 0x320   : >> { %s439_s23 = scalar_lea.vmem %s945_s24, %s640_s8 [#allocation2]   ;;  %s440_s18 = scalar_lea.vmem %s956_s29, %s640_s8  }
 0x325 PF: > { %s972_s9 = sand.u32 1, %s1000_s15   ;;  %s653_s10 = sshll.u32 %s962_s5, 3 }
 0x326   : > { %s445_s11 = scalar_lea.vmem %s945_s24, %s653_s10 [#allocation2]   ;;  %s447_s12 = scalar_lea.vmem %s956_s29, %s653_s10  }
 0x327   : > { %p645_p13 = scmp.le.s32.totalorder %s972_s9, 0 }
 0x328   : > { %s840_s13 = smov (!%p645_p13), %s447_s12   ;;  %s844_s14 = smov (!%p645_p13), %s445_s11  }
 0x329   : > { %585 = sbr.rel (%p645_p13) target bundleno = 826 (0x33a), region = 127  ;;  %s848_s17 = smov (!%p645_p13), 0  }
 0x32a   : > { %s852_s20 = smov (!%p645_p13), 0  }
 0x330 LB: >> { %v457_v53 = vld [vmem:[%s846_s14] sm:$0xf]  ;;  %s459_s21 = sadd.s32 1, %s850_s17  ;;  %s451_s20 = sadd.s32 1, %s854_s20   ;;  %s854_s20 = sphi %s852_s20, %s451_s20   ;;  %s850_s17 = sphi %s848_s17, %s849_s17   ;;  %s846_s14 = sphi %s844_s14, %s464_s14   ;;  %s842_s13 = sphi %s840_s13, %s465_s13  }
 0x331   : >> { %458 = vst [vmem:[%s842_s13] sm:$0xf] %v457_v53  ;;  %p460_p0 = scmp.ge.s32.totalorder %s459_s21, %s972_s9  ;;  %p450_p1 = scmp.ge.s32.totalorder %s451_s20, %s972_s9 }
 0x333   : >> { %s1004_s21 = smov (%p460_p0, %s459_s21), 0  ;;  %453 = sbr.rel (!%p450_p1) target bundleno = 816 (0x330), region = 133 }
 0x334   : >> { %s646_s24 = sshll.u32 %s1004_s21, 2  ;;  %s849_s17 = smov %s1004_s21  }
 0x335   : >> { %s464_s14 = scalar_lea.vmem %s445_s11, %s646_s24 [#allocation2]   ;;  %s465_s13 = scalar_lea.vmem %s447_s12, %s646_s24  }
 0x33a PF: > { %p11_p2 = scmp.ge.s32.totalorder %s898_s19, 4   ;;  %s996_s15 = smov %s818_s16 }
 0x33b   : > { %s997_s16 = smov %s906_s22  ;;  %s998_s17 = smov %s898_s19 }
 0x33c   :  { %13 = sbr.rel (!%p11_p2) target bundleno = 2 (0x2), region = 144 }

// kernel: net_forward.9
= control target key start
LH: loop header
LB: loop body
LE: loop exit
PB: predicated region body
PF: predicated region fallthrough
CT: control target
= control target key end

     0   :  { %s475_s15 = smov 0   ;;  %s521_s0 = inlined_call_operand.vmem [shape: bf16[16,16], index: 0, kind: input, shape index: {}]   ;;  %s522_s1 = inlined_call_operand.vmem [shape: bf16[16,16], index: 1, kind: input, shape index: {}]   ;;  %s523_s2 = inlined_call_operand.vmem [shape: bf16[1,16,16], index: 2, kind: input, shape index: {}]   ;;  %s524_s3 = inlined_call_operand.vmem [shape: f32[4,16], index: 3, kind: input, shape index: {}]   ;;  %s525_s4 = inlined_call_operand.vmem [shape: bf16[16,16], index: 4, kind: output, shape index: {}]  }
   0x1 LB: > { %s393_s16 = sadd.s32 4294967295, %s446_s15   ;;  %p397_p0 = scmp.ge.s32.totalorder %s446_s15, 1  ;;  %s446_s15 = sphi %s475_s15, %s14_s15  }
   0x2   : > { %p161_p1 = scmp.lt.s32.totalorder %s446_s15, 3 }
   0x4   : > { %p162_p2 = pnand %p397_p0, %p161_p1 }
   0x5   : > { %v436_v0 = vld [vmem:[%s522_s1] sm:$0xff] (!%p162_p2)   ;;  %v448_v1 = vmov (!%p162_p2), 0.0   ;;  %p185_p3 = scmp.lt.s32.totalorder (!%p162_p2), %s393_s16, 1  ;;  %vm449_vm0 = vmmov (!%p162_p2), 0   ;;  %vm208_vm1 = vcmask (!%p162_p2), 130048   ;;  %vm338_vm2 = vcmask (!%p162_p2), 125952  }
   0x6   : > { %165 = sbr.rel (%p162_p2) target bundleno = 767 (0x2ff), region = 36  ;;  %414 = vmatprep.subr.bf16.mxu0 (!%p162_p2), %v448_v1  ;;  %420 = vmatprep.subr.bf16.mxu1 (!%p162_p2), %v448_v1  ;;  %v437_v3 = vld [vmem:[%s523_s2] sm:$0xff] (!%p162_p2)  }
   0x7   : > { %415 = vmatpush3.bf16.msra.mxu0 (!%p162_p2), %v436_v0  ;;  %416 = vmatprep.mubr.msk.bf16.mxu0 (!%p162_p2), %vm449_vm0, %v448_v1  ;;  %v400_v4 = vld [vmem:[%s524_s3] ss:$0 sm:$0xff] (!%p162_p2)  ;;  %v403_v12 = vld [vmem:[%s524_s3 + $0x1] ss:$0 sm:$0xff] (!%p162_p2)  ;;  %v406_v29 = vld [vmem:[%s524_s3 + $0x2] ss:$0 sm:$0xff] (!%p162_p2) }
   0x8   : > { %422 = vmatprep.mubr.msk.bf16.mxu1 (!%p162_p2), %vm449_vm0, %v448_v1  ;;  %421 = vmatpush3.bf16.msra.mxu1 (!%p162_p2), %v437_v3  ;;  %v407_v31 = vld [vmem:[%s524_s3 + $0x3] ss:$0 sm:$0xff] (!%p162_p2) }
   0xd   : > { %s527_s16 = smov (!%p185_p3, %s393_s16), 1 }
   0xe   : > { %s398_s19 = sshll.u32 %s527_s16, 2 }
   0xf   : > { %s188_s22 = scalar_lea.vmem %s521_s0, %s398_s19  ;;  %s192_s9 = scalar_lea.vmem %s525_s4, %s398_s19 }
  0x10   : > { %v194_v2 = vld [vmem:[%s188_s22] sm:$0xf] }
  0x11   : > { %417 = vmatmul.mubr.msk.bf16.vlgmr.msra.gmra.mrb[0].mxu0 %vm208_vm1, %v194_v2 }
  0xe4   : > { %v246_v5 = vpop.f32.mrb[0].mxu0 }
  0xe5   : > { %v247_v6 = vadd.f32 %v400_v4, %v246_v5  ;;  %v418_v7 = vpop.f32.mrb[1].mxu0 }
  0xe6   : > { %v249_v8 = vpop.f32.mrb[2].mxu0 }
  0xe7   : > { %v252_v9 = vmax.f32 %v247_v6, 0.0  ;;  %v419_v10 = vpop.f32.mrb[3].mxu0 }
  0xe9   : > { %v255_v11 = vpack.c.bf16 %v252_v9, %v252_v9 }
  0xeb   : > { %423 = vmatmul.mubr.msk.bf16.vlgmr.msra.gmra.mrb[0].mxu1 %vm208_vm1, %v255_v11 }
 0x1be   : > { %v304_v13 = vpop.f32.mrb[0].mxu1 }
 0x1bf   : > { %v305_v14 = vadd.f32 %v403_v12, %v304_v13  ;;  %v424_v15 = vpop.f32.mrb[1].mxu1 }
 0x1c0   : > { %v307_v16 = vpop.f32.mrb[2].mxu1 }
 0x1c1   : > { %v310_v17 = vmax.f32 %v305_v14, 0.0  ;;  %v425_v18 = vpop.f32.mrb[3].mxu1 }
 0x1c3   : > { %v313_v19 = vsel %vm208_vm1, %v310_v17, 0.0 }
 0x1c4   : > { %314 = vadd.xlane.f32.xlu0 %v313_v19 }
 0x251   : > { %v315_v20 = vpop.xlane.xlu0 %314 }
 0x252   : > { %v317_v21 = vmul.f32 0.0625, %v315_v20 }
 0x254   : > { %v318_v22 = vsub.f32 %v310_v17, %v317_v21 }
 0x256   : > { %v319_v23 = vmul.f32 %v318_v22, %v318_v22 }
 0x258   : > { %v320_v24 = vsel %vm208_vm1, %v319_v23, 0.0 }
 0x259   : > { %321 = vadd.xlane.f32.xlu0 %v320_v24 }
 0x2e6   : > { %v322_v25 = vpop.xlane.xlu0 %321 }
 0x2e7   : > { %v323_v26 = vmul.f32 0.0625, %v322_v25 }
 0x2e9   : > { %v324_v27 = vadd.f32 1e-05, %v323_v26 }
 0x2eb   : > { %438 = vrsqrt.f32 %v324_v27 }
 0x2f5   : > { %v439_v28 = vpop.eup %438 }
 0x2f6   : > { %v326_v30 = vmul.f32 %v439_v28, %v318_v22 }
 0x2f8   : > { %v331_v32 = vmul.f32 %v406_v29, %v326_v30 }
 0x2fa   : > { %v336_v33 = vadd.f32 %v407_v31, %v331_v32 }
 0x2fc   : > { %v337_v34 = vpack.c.bf16 %v336_v33, %v336_v33 }
 0x2fe   : > { %339 = vst.msk [vmem:[%s192_s9] sm:$0xf] %vm338_vm2, %v337_v34 }
 0x2ff PF: > { %s14_s15 = sadd.s32 1, %s446_s15  }
 0x300   : > { %p11_p4 = scmp.ge.s32.totalorder %s14_s15, 4  }
 0x302   :  { %13 = sbr.rel (!%p11_p4) target bundleno = 1 (0x1), region = 66 }

// kernel: div.35
= control target key start
LH: loop header
LB: loop body
LE: loop exit
PB: predicated region body
PF: predicated region fallthrough
CT: control target
= control target key end

     0   :  { %3 = vsyncpa [#allocation1], 0  ;;  %s49_s9 = smov [#allocation0]   ;;  %s83_s0 = inlined_call_operand.hbm [shape: f32[2], index: 0, kind: input, shape index: {}]   ;;  %s84_s1 = inlined_call_operand.vmem [shape: f32[2], index: 1, kind: input, shape index: {}]   ;;  %s85_s2 = inlined_call_operand.vmem [shape: f32[2], index: 2, kind: output, shape index: {}]  }
   0x1   :  { %s8_s10 = sshll.u32 %s49_s9, 4  ;;  %s25_s13 = scalar_lea.hbm %s83_s0, 16  ;;  %s9_s10 = int_to_ptr.vmem [resolvable:$true] %s8_s10 }
   0x2   :  { %p26_p0 = scmp.ne.s32.totalorder %s83_s0, %s25_s13  ;;  %p29_p1 = scmp.lt.u32.totalorder %s25_s13, %s83_s0 }
   0x4   :  { %p31_p2 = pnand %p29_p1, %p26_p0 }
   0x6   :  { %34 = shalt.err (!%p31_p2)
}
   0x7   :  { %s35_s18 = scalar_lea.vmem %s9_s10, 16  ;;  %s39_s19 = scalar_lea.vmem %s9_s10, 32 }
   0x8   :  { %p36_p3 = scmp.ne.s32.totalorder %s9_s10, %s35_s18  ;;  %p40_p4 = scmp.lt.s32.totalorder %s9_s10, %s9_s10 }
   0x9   :  { %p41_p5 = scmp.lt.s32.totalorder %s39_s19, %s35_s18 }
   0xb   :  { %p42_p6 = por %p41_p5, %p40_p4 }
   0xd   :  { %p43_p7 = pnand %p42_p6, %p36_p3 }
   0xf   :  { %46 = shalt.err (!%p43_p7)
}
  0x10   :  { %11 = dma.hbm_to_vmem [thread:$0]  %s83_s0, 16, %s9_s10, [#allocation1]  }
  0x11   :  { %47 = dma.done.wait [#allocation1], 16  }
  0x12   :  { %48 = vsyncadd [#allocation1], 4294967280  ;;  %v14_v0 = vld [vmem:[%s84_s1] sm:$0x1] }
  0x13   :  { %23 = vrcp.f32 %v14_v0  ;;  %v13_v1 = vld [vmem:[#allocation0] sm:$0x1] }
  0x1d   :  { %v24_v2 = vpop.eup %23 }
  0x1e   :  { %v18_v3 = vmul.f32 %v24_v2, %v13_v1 }
  0x20   :  { %20 = vst [vmem:[%s85_s2] sm:$0x1] %v18_v3 }
  0x21   :  { %21 = vsyncpa [#allocation1], 1 }

// kernel: net_forward.11
= control target key start
LH: loop header
LB: loop body
LE: loop exit
PB: predicated region body
PF: predicated region fallthrough
CT: control target
= control target key end

     0   :  { %s654_s23 = smov 0   ;;  %s706_s0 = inlined_call_operand.<no memory space> [shape: f32[1], index: 0, kind: input, shape index: {}]   ;;  %s707_s1 = inlined_call_operand.vmem [shape: bf16[16,16], index: 1, kind: input, shape index: {}]   ;;  %s708_s2 = inlined_call_operand.vmem [shape: bf16[16,16], index: 2, kind: input, shape index: {}]   ;;  %s709_s3 = inlined_call_operand.vmem [shape: bf16[16,32], index: 3, kind: input, shape index: {}]   ;;  %s710_s4 = inlined_call_operand.vmem [shape: bf16[2,32,32], index: 4, kind: input, shape index: {}]   ;;  %s711_s5 = inlined_call_operand.vmem [shape: f32[3,32], index: 5, kind: input, shape index: {}]   ;;  %s712_s6 = inlined_call_operand.vmem [shape: bf16[16,32], index: 6, kind: output, shape index: {}]  }
   0x1   :  { %11 = sst [smem:[#allocation2]] %s706_s0 }
   0x2 LB: > { %s536_s24 = sadd.s32 4294967295, %s612_s23   ;;  %p540_p0 = scmp.ge.s32.totalorder %s612_s23, 1  ;;  %s612_s23 = sphi %s654_s23, %s17_s23  }
   0x3   : > { %p221_p1 = scmp.lt.s32.totalorder %s612_s23, 3 }
   0x5   : > { %p222_p2 = pnand %p540_p0, %p221_p1 }
   0x6   : > { %v601_v0 = vld [vmem:[%s709_s3] sm:$0xff] (!%p222_p2)   ;;  %v614_v1 = vmov (!%p222_p2), 0.0   ;;  %p253_p3 = scmp.lt.s32.totalorder (!%p222_p2), %s536_s24, 1  ;;  %s266_s0 = sld [smem:[#allocation2]] (!%p222_p2)  ;;  %vm615_vm0 = vmmov (!%p222_p2), 0   ;;  %vm289_vm1 = vcmask (!%p222_p2), 130048  }
   0x7   : > { %225 = sbr.rel (%p222_p2) target bundleno = 681 (0x2a9), region = 44  ;;  %569 = vmatprep.subr.bf16.mxu0 (!%p222_p2), %v614_v1  ;;  %575 = vmatprep.subr.bf16.mxu1 (!%p222_p2), %v614_v1  ;;  %v602_v10 = vld [vmem:[%s710_s4] sm:$0xff] (!%p222_p2)   ;;  %v603_v11 = vld [vmem:[%s710_s4 + $0x8] sm:$0xff] (!%p222_p2)   ;;  %v604_v12 = vld [vmem:[%s710_s4 + $0x10] sm:$0xff] (!%p222_p2)   ;;  %vm356_vm2 = vcmask (!%p222_p2), 261120   ;;  %vm469_vm3 = vcmask (!%p222_p2), 257024  }
   0x8   : > { %570 = vmatpush3.bf16.msra.mxu0 (!%p222_p2), %v601_v0  ;;  %571 = vmatprep.mubr.msk.bf16.mxu0 (!%p222_p2), %vm615_vm0, %v614_v1  ;;  %v544_v13 = vld [vmem:[%s711_s5] ss:$0 sm:$0xff] (!%p222_p2)  ;;  %v605_v21 = vld [vmem:[%s710_s4 + $0x18] sm:$0xff] (!%p222_p2)   ;;  %v547_v22 = vld [vmem:[%s711_s5 + $0x1] ss:$0 sm:$0xff] (!%p222_p2) }
   0x9   : > { %579 = vmatprep.mubr.msk.bf16.mxu1 (!%p222_p2), %vm615_vm0, %v614_v1  ;;  %583 = vmatprep.subr.bf16.mxu0 (!%p222_p2), %v614_v1  ;;  %v555_v30 = vld [vmem:[%s711_s5 + $0x2] ss:$0 sm:$0xff] (!%p222_p2) }
   0xa   : > { %576 = vmatpush3.bf16.msra.mxu1 (!%p222_p2), %v602_v10 }
   0xb   : > { %577 = vmatprep.subr.bf16.mxu1 (!%p222_p2), %v614_v1 }
   0xc   : > { %s267_s10 = sadd.f32 (!%p222_p2), 1.0, %s266_s0 }
   0xe   : > { %s714_s24 = smov (!%p253_p3, %s536_s24), 1  ;;  %v270_v6 = vstv %s267_s10  ;;  %578 = vmatpush3.bf16.msra.mxu1 %v603_v11 }
   0xf   : > { %s667_s27 = sshll.u32 %s714_s24, 2 }
  0x10   : > { %s256_s30 = scalar_lea.vmem %s707_s1, %s667_s27  ;;  %s260_s9 = scalar_lea.vmem %s708_s2, %s667_s27 }
  0x11   : > { %v268_v2 = vld [vmem:[%s256_s30] sm:$0xf]  ;;  %s264_s28 = scalar_lea.vmem %s712_s6, %s667_s27 }
  0x12   : > { %v272_v3 = vld [vmem:[%s260_s9] sm:$0xf]  ;;  %v269_v4 = vunpack.c.l.bf16 %v268_v2 }
  0x13   : > { %v273_v5 = vunpack.c.l.bf16 %v272_v3 }
  0x14   : > { %v271_v7 = vmul.f32 %v270_v6, %v269_v4 }
  0x16   : > { %v274_v8 = vadd.f32 %v273_v5, %v271_v7 }
  0x18   : > { %v277_v9 = vpack.c.bf16 %v274_v8, %v274_v8 }
  0x1a   : > { %572 = vmatmul.mubr.msk.bf16.vlgmr.msra.gmra.mrb[0].mxu0 %vm289_vm1, %v277_v9 }
  0x1b   : > { %587 = vmatprep.mubr.msk.bf16.mxu0 %vm615_vm0, %v614_v1  ;;  %584 = vmatpush3.bf16.msra.mxu0 %v604_v12 }
  0x1c   : > { %585 = vmatprep.subr.bf16.mxu0 %v614_v1 }
  0x1f   : > { %586 = vmatpush3.bf16.msra.mxu0 %v605_v21 }
  0xed   : > { %v327_v14 = vpop.f32.mrb[0].mxu0 }
  0xee   : > { %v328_v15 = vadd.f32 %v544_v13, %v327_v14  ;;  %v573_v16 = vpop.f32.mrb[1].mxu0 }
  0xef   : > { %v330_v17 = vpop.f32.mrb[2].mxu0 }
  0xf0   : > { %v333_v18 = vmax.f32 %v328_v15, 0.0  ;;  %v574_v19 = vpop.f32.mrb[3].mxu0 }
  0xf2   : > { %v338_v20 = vpack.c.bf16 %v333_v18, %v333_v18 }
  0xf4   : > { %580 = vmatmul.mubr.msk.bf16.vlgmr.msra.gmra.mrb[0].mxu1 %vm356_vm2, %v338_v20 }
 0x1c7   : > { %v394_v23 = vpop.f32.mrb[0].mxu1 }
 0x1c8   : > { %v395_v24 = vadd.f32 %v547_v22, %v394_v23  ;;  %v581_v25 = vpop.f32.mrb[1].mxu1 }
 0x1c9   : > { %v397_v26 = vpop.f32.mrb[2].mxu1 }
 0x1ca   : > { %v400_v27 = vmax.f32 %v395_v24, 0.0  ;;  %v582_v28 = vpop.f32.mrb[3].mxu1 }
 0x1cc   : > { %v406_v29 = vpack.c.bf16 %v400_v27, %v400_v27 }
 0x1ce   : > { %588 = vmatmul.mubr.msk.bf16.vlgmr.msra.gmra.mrb[4].mxu0 %vm356_vm2, %v406_v29 }
 0x2a1   : > { %v461_v31 = vpop.f32.mrb[4].mxu0 }
 0x2a2   : > { %v462_v32 = vadd.f32 %v555_v30, %v461_v31  ;;  %v589_v33 = vpop.f32.mrb[5].mxu0 }
 0x2a3   : > { %v464_v34 = vpop.f32.mrb[6].mxu0 }
 0x2a4   : > { %v467_v35 = vmax.f32 %v462_v32, 0.0  ;;  %v590_v36 = vpop.f32.mrb[7].mxu0 }
 0x2a6   : > { %v468_v37 = vpack.c.bf16 %v467_v35, %v467_v35 }
 0x2a8   : > { %470 = vst.msk [vmem:[%s264_s28] sm:$0xf] %vm469_vm3, %v468_v37 }
 0x2a9 PF: > { %s17_s23 = sadd.s32 1, %s612_s23  }
 0x2aa   : > { %p14_p4 = scmp.ge.s32.totalorder %s17_s23, 4  }
 0x2ac   :  { %16 = sbr.rel (!%p14_p4) target bundleno = 2 (0x2), region = 78 }

// kernel: net_forward.12
= control target key start
LH: loop header
LB: loop body
LE: loop exit
PB: predicated region body
PF: predicated region fallthrough
CT: control target
= control target key end

     0   :  { %s989_s15 = smov 0   ;;  %s991_s16 = smov 0   ;;  %s1108_s0 = inlined_call_operand.vmem [shape: bf16[24,16], index: 0, kind: input, shape index: {}]   ;;  %s1109_s1 = inlined_call_operand.vmem [shape: bf16[16,32], index: 1, kind: input, shape index: {}]   ;;  %s1110_s2 = inlined_call_operand.vmem [shape: bf16[2,32,32], index: 2, kind: input, shape index: {}]   ;;  %s1111_s3 = inlined_call_operand.vmem [shape: f32[5,32], index: 3, kind: input, shape index: {}]   ;;  %s1112_s4 = inlined_call_operand.vmem [shape: bf16[24,32], index: 4, kind: output, shape index: {}]  }
   0x1   :  { %s993_s17 = smov 0  }
   0x2 LB: > { %s1002_s18 = sadd.s32 4294967295, %s928_s17   ;;  %s1004_s19 = sadd.s32 1, %s928_s17   ;;  %s928_s17 = sphi %s993_s17, %s1116_s17   ;;  %s924_s16 = sphi %s991_s16, %s1115_s16   ;;  %s920_s15 = sphi %s989_s15, %s1114_s15  }
   0x3   : > { %s107_s20 = ssub.s32 %s928_s17, %s1004_s19  ;;  %s110_s21 = sadd.s32 1, %s924_s16 }
   0x4   : > { %p108_p0 = scmp.eq.s32.totalorder %s107_s20, 0  ;;  %p120_p1 = scmp.ne.s32.totalorder %s924_s16, %s920_s15 }
   0x5   : > { %p121_p2 = scmp.eq.s32.totalorder %s1002_s18, 1  ;;  %p698_p3 = scmp.ge.s32.totalorder %s928_s17, 1 }
   0x6   : > { %s1012_s22 = scalar_select %p108_p0, %s924_s16, %s110_s21  }
   0x7   : > { %p1014_p4 = por %p121_p2, %p120_p1  ;;  %p171_p5 = scmp.lt.s32.totalorder %s928_s17, 3 }
   0x9   : > { %p172_p6 = pnand %p698_p3, %p171_p5 }
   0xa   : > { %v864_v0 = vld [vmem:[%s1109_s1] sm:$0xff] (!%p172_p6)   ;;  %v962_v1 = vmov (!%p172_p6), 0.0   ;;  %s1022_s26 = sshll.u32 (!%p172_p6), %s1002_s18, 1  ;;  %vm963_vm0 = vmmov (!%p172_p6), 0   ;;  %vm240_vm1 = vcmask (!%p172_p6), 130048   ;;  %v867_v4 = vld [vmem:[%s1110_s2 + $0x8] sm:$0xff] (!%p172_p6)  }
   0xb   : > { %175 = sbr.rel (%p172_p6) target bundleno = 1048 (0x418), region = 36  ;;  %752 = vmatprep.subr.bf16.mxu0 (!%p172_p6), %v962_v1  ;;  %758 = vmatprep.subr.bf16.mxu1 (!%p172_p6), %v962_v1  ;;  %p205_p7 = scmp.lt.s32.totalorder (!%p172_p6), %s1022_s26, 2  ;;  %v866_v3 = vld [vmem:[%s1110_s2] sm:$0xff] (!%p172_p6)   ;;  %vm309_vm2 = vcmask (!%p172_p6), 261120   ;;  %v868_v15 = vld [vmem:[%s1110_s2 + $0x10] sm:$0xff] (!%p172_p6)   ;;  %v869_v16 = vld [vmem:[%s1110_s2 + $0x18] sm:$0xff] (!%p172_p6)  }
   0xc   : > { %753 = vmatpush3.bf16.msra.mxu0 (!%p172_p6), %v864_v0  ;;  %754 = vmatprep.mubr.msk.bf16.mxu0 (!%p172_p6), %vm963_vm0, %v962_v1  ;;  %v702_v5 = vld [vmem:[%s1111_s3] ss:$0 sm:$0xff] (!%p172_p6)  ;;  %v706_v17 = vld [vmem:[%s1111_s3 + $0x1] ss:$0 sm:$0xff] (!%p172_p6)  ;;  %v714_v27 = vld [vmem:[%s1111_s3 + $0x2] ss:$0 sm:$0xff] (!%p172_p6) }
   0xd   : > { %762 = vmatprep.mubr.msk.bf16.mxu1 (!%p172_p6), %vm963_vm0, %v962_v1  ;;  %766 = vmatprep.subr.bf16.mxu0 (!%p172_p6), %v962_v1  ;;  %v718_v55 = vld [vmem:[%s1111_s3 + $0x3] ss:$0 sm:$0xff] (!%p172_p6)  ;;  %s197_s29 = sand.u32 (!%p172_p6), 1, %s920_s15   ;;  %v719_v57 = vld [vmem:[%s1111_s3 + $0x4] ss:$0 sm:$0xff] (!%p172_p6)  ;;  %vm474_vm3 = vcmask (!%p172_p6), 257024  }
   0xe   : > { %759 = vmatpush3.bf16.msra.mxu1 (!%p172_p6), %v866_v3  ;;  %s699_s6 = sshll.u32 (!%p172_p6), %s197_s29, 3 }
   0xf   : > { %760 = vmatprep.subr.bf16.mxu1 (!%p172_p6), %v962_v1  ;;  %s1063_s7 = scalar_lea.vmem (!%p172_p6), [#allocation2], %s699_s6  }
  0x12   : > { %s206_s27 = scalar_select %p205_p7, %s1022_s26, 2  ;;  %761 = vmatpush3.bf16.msra.mxu1 %v867_v4 }
  0x13   : > { %s485_s15 = ssub.s32 (%p1014_p4), 3, %s1022_s26  ;;  %s741_s8 = sshll.u32 (%p1014_p4), %s1002_s18, 3 }
  0x14   : > { %s701_s28 = sshll.u32 %s206_s27, 2  ;;  %p486_p8 = scmp.lt.s32.totalorder (%p1014_p4), %s485_s15, 2 }
  0x15   : > { %s208_s5 = scalar_lea.vmem %s1108_s0, %s701_s28  ;;  %s1074_s11 = scalar_lea.vmem (%p1014_p4), %s1112_s4, %s741_s8  }
  0x16   : > { %v865_v2 = vld [vmem:[%s208_s5] sm:$0xff]  }
  0x17   : > { %755 = vmatmul.mubr.msk.bf16.vlgmr.msra.gmra.mrb[0].mxu0 %vm240_vm1, %v865_v2 }
  0x18   : > { %770 = vmatprep.mubr.msk.bf16.mxu0 %vm963_vm0, %v962_v1  ;;  %767 = vmatpush3.bf16.msra.mxu0 %v868_v15 }
  0x19   : > { %768 = vmatprep.subr.bf16.mxu0 %v962_v1 }
  0x1c   : > { %769 = vmatpush3.bf16.msra.mxu0 %v869_v16 }
  0xea   : > { %v278_v6 = vpop.f32.mrb[0].mxu0 }
  0xeb   : > { %v279_v7 = vadd.f32 %v702_v5, %v278_v6  ;;  %v756_v8 = vpop.f32.mrb[1].mxu0 }
  0xec   : > { %v281_v9 = vpop.f32.mrb[2].mxu0 }
  0xed   : > { %v282_v10 = vadd.f32 %v702_v5, %v281_v9  ;;  %v757_v11 = vpop.f32.mrb[3].mxu0  ;;  %v285_v12 = vmax.f32 %v279_v7, 0.0 }
  0xef   : > { %v286_v13 = vmax.f32 %v282_v10, 0.0 }
  0xf1   : > { %v291_v14 = vpack.c.bf16 %v286_v13, %v285_v12 }
  0xf3   : > { %763 = vmatmul.mubr.msk.bf16.vlgmr.msra.gmra.mrb[0].mxu1 %vm309_vm2, %v291_v14 }
 0x1c6   : > { %v347_v18 = vpop.f32.mrb[0].mxu1 }
 0x1c7   : > { %v348_v19 = vadd.f32 %v706_v17, %v347_v18  ;;  %v764_v20 = vpop.f32.mrb[1].mxu1 }
 0x1c8   : > { %v350_v21 = vpop.f32.mrb[2].mxu1 }
 0x1c9   : > { %v351_v22 = vadd.f32 %v706_v17, %v350_v21  ;;  %v765_v23 = vpop.f32.mrb[3].mxu1  ;;  %v354_v24 = vmax.f32 %v348_v19, 0.0 }
 0x1cb   : > { %v355_v25 = vmax.f32 %v351_v22, 0.0 }
 0x1cd   : > { %v361_v26 = vpack.c.bf16 %v355_v25, %v354_v24 }
 0x1cf   : > { %771 = vmatmul.mubr.msk.bf16.vlgmr.msra.gmra.mrb[4].mxu0 %vm309_vm2, %v361_v26 }
 0x2a2   : > { %v416_v28 = vpop.f32.mrb[4].mxu0 }
 0x2a3   : > { %v417_v29 = vadd.f32 %v714_v27, %v416_v28  ;;  %v772_v30 = vpop.f32.mrb[5].mxu0 }
 0x2a4   : > { %v419_v31 = vpop.f32.mrb[6].mxu0 }
 0x2a5   : > { %v423_v32 = vmax.f32 %v417_v29, 0.0  ;;  %v420_v33 = vadd.f32 %v714_v27, %v419_v31  ;;  %v773_v34 = vpop.f32.mrb[7].mxu0 }
 0x2a7   : > { %v424_v35 = vmax.f32 %v420_v33, 0.0  ;;  %v427_v36 = vsel %vm309_vm2, %v423_v32, 0.0 }
 0x2a8   : > { %428 = vadd.xlane.f32.xlu0 %v427_v36 }
 0x2a9   : > { %v430_v37 = vsel %vm309_vm2, %v424_v35, 0.0 }
 0x2ac   : > { %431 = vadd.xlane.f32.xlu0 %v430_v37 }
 0x335   : > { %v429_v38 = vpop.xlane.xlu0 %428 }
 0x336   : > { %v434_v39 = vmul.f32 0.03125, %v429_v38 }
 0x338   : > { %v436_v40 = vsub.f32 %v423_v32, %v434_v39 }
 0x339   : > { %v432_v41 = vpop.xlane.xlu0 %431 }
 0x33a   : > { %v435_v42 = vmul.f32 0.03125, %v432_v41  ;;  %v438_v43 = vmul.f32 %v436_v40, %v436_v40 }
 0x33c   : > { %v437_v44 = vsub.f32 %v424_v35, %v435_v42  ;;  %v440_v45 = vsel %vm309_vm2, %v438_v43, 0.0 }
 0x33d   : > { %441 = vadd.xlane.f32.xlu1 %v440_v45 }
 0x33e   : > { %v439_v46 = vmul.f32 %v437_v44, %v437_v44 }
 0x340   : > { %v443_v47 = vsel %vm309_vm2, %v439_v46, 0.0 }
 0x341   : > { %444 = vadd.xlane.f32.xlu1 %v443_v47 }
 0x3ca   : > { %v442_v48 = vpop.xlane.xlu1 %441 }
 0x3cb   : > { %v446_v49 = vmul.f32 0.03125, %v442_v48 }
 0x3cd   : > { %v448_v50 = vadd.f32 1e-05, %v446_v49 }
 0x3ce   : > { %v445_v51 = vpop.xlane.xlu1 %444 }
 0x3cf   : > { %870 = vrsqrt.f32 %v448_v50  ;;  %v447_v52 = vmul.f32 0.03125, %v445_v51 }
 0x3d1   : > { %v449_v53 = vadd.f32 1e-05, %v447_v52 }
 0x3d3   : > { %872 = vrsqrt.f32 %v449_v53 }
 0x3d9   : > { %v871_v54 = vpop.eup %870 }
 0x3da   : > { %v452_v56 = vmul.f32 %v871_v54, %v436_v40 }
 0x3dc   : > { %v458_v58 = vmul.f32 %v718_v55, %v452_v56 }
 0x3dd   : > { %v873_v59 = vpop.eup %872 }
 0x3de   : > { %v464_v60 = vadd.f32 %v719_v57, %v458_v58  ;;  %v453_v61 = vmul.f32 %v873_v59, %v437_v44 }
 0x3e0   : > { %v739_v62 = vpack.c.bf16 %v464_v60, %v464_v60  ;;  %v459_v63 = vmul.f32 %v718_v55, %v453_v61  ;;  %483 = sbr.rel (!%p1014_p4) target bundleno = 1048 (0x418), region = 40 }
 0x3e2   : > { %475 = vst.msk [vmem:[%s1063_s7] sm:$0xf] %vm474_vm3, %v739_v62  ;;  %v465_v0 = vadd.f32 %v719_v57, %v459_v63 }
 0x3e4   : > { %v740_v1 = vpack.c.bf16 %v465_v0, %v465_v0 }
 0x3e6   : > { %476 = vst.msk [vmem:[%s1063_s7 + $0x4] sm:$0xf] %vm474_vm3, %v740_v1 }
 0x3e7   : > { %s1118_s15 = smov (!%p486_p8, %s485_s15), 2 }
 0x3e8   : > { %s724_s12 = sshll.u32 %s1118_s15, 6 }
 0x3e9   : > { %p727_p9 = scmp.eq.s32.totalorder %s724_s12, 0 }
 0x3ea   : > { %s1080_s13 = sshrl.u32 (!%p727_p9), %s1118_s15, 1 }
 0x3eb   : > { %494 = sbr.rel (%p727_p9) target bundleno = 1048 (0x418), region = 44  ;;  %p728_p10 = scmp.le.s32.totalorder (!%p727_p9), %s1080_s13, 0 }
 0x3f2   : > { %651 = sbr.rel (%p728_p10) target bundleno = 1027 (0x403), region = 117  ;;  %s930_s18 = smov (!%p728_p10), %s1074_s11  }
 0x3f3   : > { %s934_s23 = smov (!%p728_p10), %s1063_s7   ;;  %s938_s26 = smov (!%p728_p10), 0  }
 0x3f4   : > { %s942_s14 = smov (!%p728_p10), 0  }
 0x3f9 LB: >> { %v510_v2 = vld [vmem:[%s936_s23] sm:$0xf]  ;;  %v512_v3 = vld [vmem:[%s936_s23 + $0x4] sm:$0xf]  ;;  %s514_s17 = sadd.s32 1, %s940_s26  ;;  %s504_s14 = sadd.s32 1, %s944_s14   ;;  %s944_s14 = sphi %s942_s14, %s504_s14   ;;  %s940_s26 = sphi %s938_s26, %s939_s26   ;;  %s936_s23 = sphi %s934_s23, %s519_s23   ;;  %s932_s18 = sphi %s930_s18, %s520_s18  }
 0x3fa   : >> { %511 = vst [vmem:[%s932_s18] sm:$0xf] %v510_v2  ;;  %513 = vst [vmem:[%s932_s18 + $0x4] sm:$0xf] %v512_v3  ;;  %p515_p11 = scmp.ge.s32.totalorder %s514_s17, %s1080_s13  ;;  %p503_p12 = scmp.ge.s32.totalorder %s504_s14, %s1080_s13 }
 0x3fc   : >> { %s1120_s17 = smov (%p515_p11, %s514_s17), 0  ;;  %506 = sbr.rel (!%p503_p12) target bundleno = 1017 (0x3f9), region = 123 }
 0x3fd   : >> { %s729_s20 = sshll.u32 %s1120_s17, 3  ;;  %s939_s26 = smov %s1120_s17  }
 0x3fe   : >> { %s519_s23 = scalar_lea.vmem %s1063_s7, %s729_s20 [#allocation2]   ;;  %s520_s18 = scalar_lea.vmem %s1074_s11, %s729_s20  }
 0x403 PF: > { %s1090_s21 = sand.u32 1, %s1118_s15   ;;  %s742_s24 = sshll.u32 %s1080_s13, 3 }
 0x404   : > { %s525_s25 = scalar_lea.vmem %s1063_s7, %s742_s24 [#allocation2]   ;;  %s527_s27 = scalar_lea.vmem %s1074_s11, %s742_s24  }
 0x405   : > { %p734_p13 = scmp.le.s32.totalorder %s1090_s21, 0 }
 0x406   : > { %s946_s28 = smov (!%p734_p13), %s527_s27   ;;  %s950_s29 = smov (!%p734_p13), %s525_s25  }
 0x407   : > { %665 = sbr.rel (%p734_p13) target bundleno = 1048 (0x418), region = 128  ;;  %s954_s30 = smov (!%p734_p13), 0  }
 0x408   : > { %s958_s5 = smov (!%p734_p13), 0  }
 0x40e LB: >> { %v537_v4 = vld [vmem:[%s952_s29] sm:$0xf]  ;;  %s539_s6 = sadd.s32 1, %s956_s30  ;;  %s531_s5 = sadd.s32 1, %s960_s5   ;;  %s960_s5 = sphi %s958_s5, %s531_s5   ;;  %s956_s30 = sphi %s954_s30, %s955_s30   ;;  %s952_s29 = sphi %s950_s29, %s544_s29   ;;  %s948_s28 = sphi %s946_s28, %s545_s28  }
 0x40f   : >> { %538 = vst [vmem:[%s948_s28] sm:$0xf] %v537_v4  ;;  %p540_p0 = scmp.ge.s32.totalorder %s539_s6, %s1090_s21  ;;  %p530_p1 = scmp.ge.s32.totalorder %s531_s5, %s1090_s21 }
 0x411   : >> { %s1122_s6 = smov (%p540_p0, %s539_s6), 0  ;;  %533 = sbr.rel (!%p530_p1) target bundleno = 1038 (0x40e), region = 134 }
 0x412   : >> { %s735_s7 = sshll.u32 %s1122_s6, 2  ;;  %s955_s30 = smov %s1122_s6  }
 0x413   : >> { %s544_s29 = scalar_lea.vmem %s525_s25, %s735_s7 [#allocation2]   ;;  %s545_s28 = scalar_lea.vmem %s527_s27, %s735_s7  }
 0x418 PF: > { %p11_p2 = scmp.ge.s32.totalorder %s1004_s19, 4   ;;  %s1114_s15 = smov %s924_s16 }
 0x419   : > { %s1115_s16 = smov %s1012_s22  ;;  %s1116_s17 = smov %s1004_s19 }
 0x41a   :  { %13 = sbr.rel (!%p11_p2) target bundleno = 2 (0x2), region = 145 }

// kernel: net_forward.13
= control target key start
LH: loop header
LB: loop body
LE: loop exit
PB: predicated region body
PF: predicated region fallthrough
CT: control target
= control target key end

     0   :  { %s666_s23 = smov 0   ;;  %s724_s0 = inlined_call_operand.<no memory space> [shape: f32[1], index: 0, kind: input, shape index: {}]   ;;  %s725_s1 = inlined_call_operand.vmem [shape: bf16[16,32], index: 1, kind: input, shape index: {}]   ;;  %s726_s2 = inlined_call_operand.vmem [shape: bf16[16,32], index: 2, kind: input, shape index: {}]   ;;  %s727_s3 = inlined_call_operand.vmem [shape: bf16[32,32], index: 3, kind: input, shape index: {}]   ;;  %s728_s4 = inlined_call_operand.vmem [shape: bf16[2,32,32], index: 4, kind: input, shape index: {}]   ;;  %s729_s5 = inlined_call_operand.vmem [shape: f32[3,32], index: 5, kind: input, shape index: {}]   ;;  %s730_s6 = inlined_call_operand.vmem [shape: bf16[16,32], index: 6, kind: output, shape index: {}]  }
   0x1   :  { %11 = sst [smem:[#allocation2]] %s724_s0 }
   0x2 LB: > { %s543_s24 = sadd.s32 4294967295, %s624_s23   ;;  %p547_p0 = scmp.ge.s32.totalorder %s624_s23, 1  ;;  %s624_s23 = sphi %s666_s23, %s17_s23  }
   0x3   : > { %p221_p1 = scmp.lt.s32.totalorder %s624_s23, 3 }
   0x5   : > { %p222_p2 = pnand %p547_p0, %p221_p1 }
   0x6   : > { %v612_v0 = vld [vmem:[%s727_s3] sm:$0xff] (!%p222_p2)   ;;  %v626_v1 = vmov (!%p222_p2), 0.0   ;;  %v613_v2 = vld [vmem:[%s727_s3 + $0x8] sm:$0xff] (!%p222_p2)   ;;  %vm627_vm0 = vmmov (!%p222_p2), 0   ;;  %p253_p3 = scmp.lt.s32.totalorder (!%p222_p2), %s543_s24, 1  ;;  %s266_s28 = sld [smem:[#allocation2]] (!%p222_p2) }
   0x7   : > { %225 = sbr.rel (%p222_p2) target bundleno = 681 (0x2a9), region = 44  ;;  %578 = vmatprep.subr.bf16.mxu0 (!%p222_p2), %v626_v1  ;;  %586 = vmatprep.subr.bf16.mxu1 (!%p222_p2), %v626_v1  ;;  %vm297_vm1 = vcmask (!%p222_p2), 261120   ;;  %v614_v11 = vld [vmem:[%s728_s4] sm:$0xff] (!%p222_p2)   ;;  %v615_v12 = vld [vmem:[%s728_s4 + $0x8] sm:$0xff] (!%p222_p2)   ;;  %v616_v13 = vld [vmem:[%s728_s4 + $0x10] sm:$0xff] (!%p222_p2)   ;;  %vm476_vm2 = vcmask (!%p222_p2), 257024  }
   0x8   : > { %579 = vmatpush3.bf16.msra.mxu0 (!%p222_p2), %v612_v0  ;;  %582 = vmatprep.mubr.msk.bf16.mxu0 (!%p222_p2), %vm627_vm0, %v626_v1  ;;  %v551_v14 = vld [vmem:[%s729_s5] ss:$0 sm:$0xff] (!%p222_p2)  ;;  %v617_v22 = vld [vmem:[%s728_s4 + $0x18] sm:$0xff] (!%p222_p2)   ;;  %v555_v23 = vld [vmem:[%s729_s5 + $0x1] ss:$0 sm:$0xff] (!%p222_p2) }
   0x9   : > { %580 = vmatprep.subr.bf16.mxu0 (!%p222_p2), %v626_v1  ;;  %590 = vmatprep.mubr.msk.bf16.mxu1 (!%p222_p2), %vm627_vm0, %v626_v1  ;;  %v563_v31 = vld [vmem:[%s729_s5 + $0x2] ss:$0 sm:$0xff] (!%p222_p2) }
   0xa   : > { %587 = vmatpush3.bf16.msra.mxu1 (!%p222_p2), %v614_v11 }
   0xb   : > { %588 = vmatprep.subr.bf16.mxu1 (!%p222_p2), %v626_v1 }
   0xc   : > { %581 = vmatpush3.bf16.msra.mxu0 (!%p222_p2), %v613_v2  ;;  %s267_s12 = sadd.f32 (!%p222_p2), 1.0, %s266_s28 }
   0xd   : > { %594 = vmatprep.subr.bf16.mxu0 (!%p222_p2), %v626_v1 }
   0xe   : > { %s732_s24 = smov (!%p253_p3, %s543_s24), 1  ;;  %v270_v7 = vstv %s267_s12  ;;  %589 = vmatpush3.bf16.msra.mxu1 %v615_v12 }
   0xf   : > { %s682_s29 = sshll.u32 %s732_s24, 2 }
  0x10   : > { %s256_s8 = scalar_lea.vmem %s725_s1, %s682_s29  ;;  %s260_s11 = scalar_lea.vmem %s726_s2, %s682_s29 }
  0x11   : > { %v268_v3 = vld [vmem:[%s256_s8] sm:$0xf]  ;;  %s264_s30 = scalar_lea.vmem %s730_s6, %s682_s29 }
  0x12   : > { %v272_v4 = vld [vmem:[%s260_s11] sm:$0xf]  ;;  %v269_v5 = vunpack.c.l.bf16 %v268_v3 }
  0x13   : > { %v273_v6 = vunpack.c.l.bf16 %v272_v4 }
  0x14   : > { %v271_v8 = vmul.f32 %v270_v7, %v269_v5 }
  0x16   : > { %v274_v9 = vadd.f32 %v273_v6, %v271_v8 }
  0x18   : > { %v279_v10 = vpack.c.bf16 %v274_v9, %v274_v9 }
  0x1a   : > { %583 = vmatmul.mubr.msk.bf16.vlgmr.msra.gmra.mrb[0].mxu0 %vm297_vm1, %v279_v10 }
  0x1b   : > { %598 = vmatprep.mubr.msk.bf16.mxu0 %vm627_vm0, %v626_v1  ;;  %595 = vmatpush3.bf16.msra.mxu0 %v616_v13 }
  0x1c   : > { %596 = vmatprep.subr.bf16.mxu0 %v626_v1 }
  0x1f   : > { %597 = vmatpush3.bf16.msra.mxu0 %v617_v22 }
  0xed   : > { %v335_v15 = vpop.f32.mrb[0].mxu0 }
  0xee   : > { %v336_v16 = vadd.f32 %v551_v14, %v335_v15  ;;  %v584_v17 = vpop.f32.mrb[1].mxu0 }
  0xef   : > { %v338_v18 = vpop.f32.mrb[2].mxu0 }
  0xf0   : > { %v341_v19 = vmax.f32 %v336_v16, 0.0  ;;  %v585_v20 = vpop.f32.mrb[3].mxu0 }
  0xf2   : > { %v346_v21 = vpack.c.bf16 %v341_v19, %v341_v19 }
  0xf4   : > { %591 = vmatmul.mubr.msk.bf16.vlgmr.msra.gmra.mrb[0].mxu1 %vm297_vm1, %v346_v21 }
 0x1c7   : > { %v401_v24 = vpop.f32.mrb[0].mxu1 }
 0x1c8   : > { %v402_v25 = vadd.f32 %v555_v23, %v401_v24  ;;  %v592_v26 = vpop.f32.mrb[1].mxu1 }
 0x1c9   : > { %v404_v27 = vpop.f32.mrb[2].mxu1 }
 0x1ca   : > { %v407_v28 = vmax.f32 %v402_v25, 0.0  ;;  %v593_v29 = vpop.f32.mrb[3].mxu1 }
 0x1cc   : > { %v413_v30 = vpack.c.bf16 %v407_v28, %v407_v28 }
 0x1ce   : > { %599 = vmatmul.mubr.msk.bf16.vlgmr.msra.gmra.mrb[4].mxu0 %vm297_vm1, %v413_v30 }
 0x2a1   : > { %v468_v32 = vpop.f32.mrb[4].mxu0 }
 0x2a2   : > { %v469_v33 = vadd.f32 %v563_v31, %v468_v32  ;;  %v600_v34 = vpop.f32.mrb[5].mxu0 }
 0x2a3   : > { %v471_v35 = vpop.f32.mrb[6].mxu0 }
 0x2a4   : > { %v474_v36 = vmax.f32 %v469_v33, 0.0  ;;  %v601_v37 = vpop.f32.mrb[7].mxu0 }
 0x2a6   : > { %v475_v38 = vpack.c.bf16 %v474_v36, %v474_v36 }
 0x2a8   : > { %477 = vst.msk [vmem:[%s264_s30] sm:$0xf] %vm476_vm2, %v475_v38 }
 0x2a9 PF: > { %s17_s23 = sadd.s32 1, %s624_s23  }
 0x2aa   : > { %p14_p4 = scmp.ge.s32.totalorder %s17_s23, 4  }
 0x2ac   :  { %16 = sbr.rel (!%p14_p4) target bundleno = 2 (0x2), region = 78 }

// kernel: net_forward.14
= control target key start
LH: loop header
LB: loop body
LE: loop exit
PB: predicated region body
PF: predicated region fallthrough
CT: control target
= control target key end

     0   :  { %s1413_s27 = smov 0   ;;  %s1415_s28 = smov 0   ;;  %s1576_s0 = inlined_call_operand.vmem [shape: bf16[24,32], index: 0, kind: input, shape index: {}]   ;;  %s1577_s1 = inlined_call_operand.vmem [shape: bf16[24,32], index: 1, kind: input, shape index: {}]   ;;  %s1578_s2 = inlined_call_operand.vmem [shape: bf16[24,32], index: 2, kind: input, shape index: {}]   ;;  %s1579_s3 = inlined_call_operand.vmem [shape: bf16[32,32], index: 3, kind: input, shape index: {}]   ;;  %s1580_s4 = inlined_call_operand.vmem [shape: bf16[32,32], index: 4, kind: input, shape index: {}]   ;;  %s1581_s5 = inlined_call_operand.vmem [shape: bf16[32,32], index: 5, kind: input, shape index: {}]   ;;  %s1582_s6 = inlined_call_operand.vmem [shape: bf16[2,32,32], index: 6, kind: input, shape index: {}]   ;;  %s1583_s7 = inlined_call_operand.vmem [shape: f32[5,32], index: 7, kind: input, shape index: {}]   ;;  %s1584_s8 = inlined_call_operand.vmem [shape: bf16[24,32], index: 8, kind: output, shape index: {}]  }
   0x1   :  { %s1417_s29 = smov 0  }
   0x2 LB: > { %s1426_s30 = sadd.s32 4294967295, %s1332_s29   ;;  %s1428_s9 = sadd.s32 1, %s1332_s29   ;;  %s1332_s29 = sphi %s1417_s29, %s1588_s29   ;;  %s1328_s28 = sphi %s1415_s28, %s1587_s28   ;;  %s1324_s27 = sphi %s1413_s27, %s1586_s27  }
   0x3   : > { %s205_s10 = ssub.s32 %s1332_s29, %s1428_s9  ;;  %s208_s11 = sadd.s32 1, %s1328_s28 }
   0x4   : > { %p206_p0 = scmp.eq.s32.totalorder %s205_s10, 0  ;;  %p218_p1 = scmp.ne.s32.totalorder %s1328_s28, %s1324_s27 }
   0x5   : > { %p219_p2 = scmp.eq.s32.totalorder %s1426_s30, 1  ;;  %p1057_p3 = scmp.ge.s32.totalorder %s1332_s29, 1 }
   0x6   : > { %s1436_s12 = scalar_select %p206_p0, %s1328_s28, %s208_s11  }
   0x7   : > { %p1438_p4 = por %p219_p2, %p218_p1  ;;  %p309_p5 = scmp.lt.s32.totalorder %s1332_s29, 3 }
   0x9   : > { %p310_p6 = pnand %p1057_p3, %p309_p5 }
   0xa   : > { %v1261_v0 = vld [vmem:[%s1580_s4] sm:$0xff] (!%p310_p6)   ;;  %v1366_v1 = vmov (!%p310_p6), 0.0   ;;  %v1263_v3 = vld [vmem:[%s1580_s4 + $0x8] sm:$0xff] (!%p310_p6)   ;;  %vm1367_vm0 = vmmov (!%p310_p6), 0   ;;  %s1456_s20 = sshll.u32 (!%p310_p6), %s1426_s30, 1  ;;  %vm441_vm1 = vcmask (!%p310_p6), 261120  }
   0xb   : > { %313 = sbr.rel (%p310_p6) target bundleno = 1056 (0x420), region = 52  ;;  %1131 = vmatprep.subr.bf16.mxu0 (!%p310_p6), %v1366_v1  ;;  %1139 = vmatprep.subr.bf16.mxu1 (!%p310_p6), %v1366_v1  ;;  %v1262_v2 = vld [vmem:[%s1579_s3] sm:$0xff] (!%p310_p6)   ;;  %v1264_v4 = vld [vmem:[%s1579_s3 + $0x8] sm:$0xff] (!%p310_p6)   ;;  %p369_p7 = scmp.lt.s32.totalorder (!%p310_p6), %s1456_s20, 2  ;;  %v1272_v34 = vld [vmem:[%s1582_s6 + $0x10] sm:$0xff] (!%p310_p6)   ;;  %vm809_vm2 = vcmask (!%p310_p6), 257024  }
   0xc   : > { %1132 = vmatpush3.bf16.msra.mxu0 (!%p310_p6), %v1261_v0  ;;  %1135 = vmatprep.mubr.msk.bf16.mxu0 (!%p310_p6), %vm1367_vm0, %v1366_v1  ;;  %v1267_v5 = vld [vmem:[%s1581_s5] sm:$0xff] (!%p310_p6)   ;;  %v1268_v8 = vld [vmem:[%s1581_s5 + $0x8] sm:$0xff] (!%p310_p6)   ;;  %v1273_v35 = vld [vmem:[%s1582_s6 + $0x18] sm:$0xff] (!%p310_p6)  }
   0xd   : > { %1140 = vmatpush3.bf16.msra.mxu1 (!%p310_p6), %v1262_v2  ;;  %1133 = vmatprep.subr.bf16.mxu0 (!%p310_p6), %v1366_v1  ;;  %v1270_v10 = vld [vmem:[%s1582_s6] sm:$0xff] (!%p310_p6)   ;;  %v1271_v11 = vld [vmem:[%s1582_s6 + $0x8] sm:$0xff] (!%p310_p6)  }
   0xe   : > { %1141 = vmatprep.subr.bf16.mxu1 (!%p310_p6), %v1366_v1  ;;  %1143 = vmatprep.mubr.msk.bf16.mxu1 (!%p310_p6), %vm1367_vm0, %v1366_v1  ;;  %v1077_v23 = vld [vmem:[%s1583_s7] ss:$0 sm:$0xff] (!%p310_p6)  ;;  %v1078_v36 = vld [vmem:[%s1583_s7 + $0x1] ss:$0 sm:$0xff] (!%p310_p6)  ;;  %v1086_v46 = vld [vmem:[%s1583_s7 + $0x2] ss:$0 sm:$0xff] (!%p310_p6) }
  0x10   : > { %1134 = vmatpush3.bf16.msra.mxu0 (!%p310_p6), %v1263_v3 }
  0x11   : > { %1142 = vmatpush3.bf16.msra.mxu1 (!%p310_p6), %v1264_v4  ;;  %1147 = vmatprep.subr.bf16.mxu0 (!%p310_p6), %v1366_v1 }
  0x12   : > { %s370_s23 = scalar_select %p369_p7, %s1456_s20, 2  ;;  %1155 = vmatprep.subr.bf16.mxu1 %v1366_v1 }
  0x14   : > { %s1060_s24 = sshll.u32 %s370_s23, 2 }
  0x15   : > { %s386_s11 = scalar_lea.vmem %s1577_s1, %s1060_s24  ;;  %s372_s16 = scalar_lea.vmem %s1576_s0, %s1060_s24 }
  0x16   : > { %v1265_v6 = vld [vmem:[%s386_s11] sm:$0xff]   ;;  %s400_s19 = scalar_lea.vmem %s1578_s2, %s1060_s24  ;;  %s361_s24 = sand.u32 1, %s1324_s27  }
  0x17   : > { %v1266_v7 = vld [vmem:[%s372_s16] sm:$0xff]   ;;  %1136 = vmatmul.mubr.msk.bf16.vlgmr.msra.gmra.mrb[0].mxu0 %vm441_vm1, %v1265_v6  ;;  %s1058_s29 = sshll.u32 %s361_s24, 3  ;;  %s820_s27 = ssub.s32 (%p1438_p4), 3, %s1456_s20 }
  0x18   : > { %1144 = vmatmul.mubr.msk.bf16.vlgmr.msra.gmra.mrb[0].mxu1 %vm441_vm1, %v1266_v7  ;;  %1148 = vmatpush3.bf16.msra.mxu0 %v1267_v5  ;;  %v1269_v9 = vld [vmem:[%s400_s19] sm:$0xff]   ;;  %s1531_s10 = scalar_lea.vmem [#allocation2], %s1058_s29   ;;  %s1113_s11 = sshll.u32 (%p1438_p4), %s1426_s30, 3 }
  0x19   : > { %1149 = vmatprep.subr.bf16.mxu0 %v1366_v1  ;;  %1151 = vmatprep.mubr.msk.bf16.mxu0 %vm1367_vm0, %v1366_v1  ;;  %p821_p8 = scmp.lt.s32.totalorder (%p1438_p4), %s820_s27, 2  ;;  %s1542_s16 = scalar_lea.vmem (%p1438_p4), %s1584_s8, %s1113_s11  }
  0x1a   : > { %1159 = vmatprep.mubr.msk.bf16.mxu1 %vm1367_vm0, %v1366_v1  ;;  %1156 = vmatpush3.bf16.msra.mxu1 %v1270_v10  ;;  %v1091_v10 = vld [vmem:[%s1583_s7 + $0x4] ss:$0 sm:$0xff] }
  0x1b   : > { %1157 = vmatprep.subr.bf16.mxu1 %v1366_v1 }
  0x1c   : > { %1150 = vmatpush3.bf16.msra.mxu0 %v1268_v8  ;;  %v1090_v8 = vld [vmem:[%s1583_s7 + $0x3] ss:$0 sm:$0xff] }
  0x1d   : > { %1163 = vmatprep.subr.bf16.mxu0 %v1366_v1 }
  0x1e   : > { %1158 = vmatpush3.bf16.msra.mxu1 %v1271_v11 }
  0x1f   : > { %1152 = vmatmul.mubr.msk.bf16.vlgmr.msra.gmra.mrb[4].mxu0 %vm441_vm1, %v1269_v9 }
  0x20   : > { %1167 = vmatprep.mubr.msk.bf16.mxu0 %vm1367_vm0, %v1366_v1  ;;  %1164 = vmatpush3.bf16.msra.mxu0 %v1272_v34 }
  0x21   : > { %1165 = vmatprep.subr.bf16.mxu0 %v1366_v1 }
  0x24   : > { %1166 = vmatpush3.bf16.msra.mxu0 %v1273_v35 }
  0xea   : > { %v479_v12 = vpop.f32.mrb[0].mxu0 }
  0xeb   : > { %v540_v13 = vpop.f32.mrb[0].mxu1  ;;  %v1137_v14 = vpop.f32.mrb[1].mxu0 }
  0xec   : > { %v541_v15 = vadd.f32 %v540_v13, %v479_v12  ;;  %v1145_v16 = vpop.f32.mrb[1].mxu1  ;;  %v482_v17 = vpop.f32.mrb[2].mxu0 }
  0xed   : > { %v543_v18 = vpop.f32.mrb[2].mxu1  ;;  %v1138_v19 = vpop.f32.mrb[3].mxu0 }
  0xee   : > { %v544_v20 = vadd.f32 %v543_v18, %v482_v17  ;;  %v1146_v21 = vpop.f32.mrb[3].mxu1 }
  0xf2   : > { %v607_v22 = vpop.f32.mrb[4].mxu0 }
  0xf3   : > { %v614_v24 = vadd.f32 %v607_v22, %v541_v15  ;;  %v1153_v25 = vpop.f32.mrb[5].mxu0 }
  0xf4   : > { %v610_v26 = vpop.f32.mrb[6].mxu0 }
  0xf5   : > { %v621_v27 = vadd.f32 %v1077_v23, %v614_v24  ;;  %v615_v28 = vadd.f32 %v610_v26, %v544_v20  ;;  %v1154_v29 = vpop.f32.mrb[7].mxu0 }
  0xf7   : > { %v622_v30 = vadd.f32 %v1077_v23, %v615_v28  ;;  %v623_v31 = vmax.f32 %v621_v27, 0.0 }
  0xf9   : > { %v624_v32 = vmax.f32 %v622_v30, 0.0 }
  0xfb   : > { %v629_v33 = vpack.c.bf16 %v624_v32, %v623_v31 }
  0xfd   : > { %1160 = vmatmul.mubr.msk.bf16.vlgmr.msra.gmra.mrb[4].mxu1 %vm441_vm1, %v629_v33 }
 0x1d0   : > { %v684_v37 = vpop.f32.mrb[4].mxu1 }
 0x1d1   : > { %v685_v38 = vadd.f32 %v1078_v36, %v684_v37  ;;  %v1161_v39 = vpop.f32.mrb[5].mxu1 }
 0x1d2   : > { %v687_v40 = vpop.f32.mrb[6].mxu1 }
 0x1d3   : > { %v688_v41 = vadd.f32 %v1078_v36, %v687_v40  ;;  %v1162_v42 = vpop.f32.mrb[7].mxu1  ;;  %v691_v43 = vmax.f32 %v685_v38, 0.0 }
 0x1d5   : > { %v692_v44 = vmax.f32 %v688_v41, 0.0 }
 0x1d7   : > { %v698_v45 = vpack.c.bf16 %v692_v44, %v691_v43 }
 0x1d9   : > { %1168 = vmatmul.mubr.msk.bf16.vlgmr.msra.gmra.mrb[8].mxu0 %vm441_vm1, %v698_v45 }
 0x2ac   : > { %v753_v47 = vpop.f32.mrb[8].mxu0 }
 0x2ad   : > { %v754_v48 = vadd.f32 %v1086_v46, %v753_v47  ;;  %v1169_v49 = vpop.f32.mrb[9].mxu0 }
 0x2ae   : > { %v756_v50 = vpop.f32.mrb[10].mxu0 }
 0x2af   : > { %v757_v51 = vadd.f32 %v1086_v46, %v756_v50  ;;  %v1170_v52 = vpop.f32.mrb[11].mxu0  ;;  %v762_v53 = vsel %vm441_vm1, %v754_v48, 0.0 }
 0x2b0   : > { %763 = vadd.xlane.f32.xlu0 %v762_v53 }
 0x2b1   : > { %v765_v54 = vsel %vm441_vm1, %v757_v51, 0.0 }
 0x2b4   : > { %766 = vadd.xlane.f32.xlu0 %v765_v54 }
 0x33d   : > { %v764_v55 = vpop.xlane.xlu0 %763 }
 0x33e   : > { %v769_v56 = vmul.f32 0.03125, %v764_v55 }
 0x340   : > { %v771_v57 = vsub.f32 %v754_v48, %v769_v56 }
 0x341   : > { %v767_v58 = vpop.xlane.xlu0 %766 }
 0x342   : > { %v770_v59 = vmul.f32 0.03125, %v767_v58  ;;  %v773_v60 = vmul.f32 %v771_v57, %v771_v57 }
 0x344   : > { %v772_v61 = vsub.f32 %v757_v51, %v770_v59  ;;  %v775_v62 = vsel %vm441_vm1, %v773_v60, 0.0 }
 0x345   : > { %776 = vadd.xlane.f32.xlu1 %v775_v62 }
 0x346   : > { %v774_v63 = vmul.f32 %v772_v61, %v772_v61 }
 0x348   : > { %v778_v0 = vsel %vm441_vm1, %v774_v63, 0.0 }
 0x349   : > { %779 = vadd.xlane.f32.xlu1 %v778_v0 }
 0x3d2   : > { %v777_v1 = vpop.xlane.xlu1 %776 }
 0x3d3   : > { %v781_v2 = vmul.f32 0.03125, %v777_v1 }
 0x3d5   : > { %v783_v3 = vadd.f32 1e-05, %v781_v2 }
 0x3d6   : > { %v780_v4 = vpop.xlane.xlu1 %779 }
 0x3d7   : > { %1274 = vrsqrt.f32 %v783_v3  ;;  %v782_v5 = vmul.f32 0.03125, %v780_v4 }
 0x3d9   : > { %v784_v6 = vadd.f32 1e-05, %v782_v5 }
 0x3db   : > { %1276 = vrsqrt.f32 %v784_v6 }
 0x3e1   : > { %v1275_v7 = vpop.eup %1274 }
 0x3e2   : > { %v787_v9 = vmul.f32 %v1275_v7, %v771_v57 }
 0x3e4   : > { %v793_v11 = vmul.f32 %v1090_v8, %v787_v9 }
 0x3e5   : > { %v1277_v12 = vpop.eup %1276 }
 0x3e6   : > { %v799_v13 = vadd.f32 %v1091_v10, %v793_v11  ;;  %v788_v14 = vmul.f32 %v1277_v12, %v772_v61 }
 0x3e8   : > { %v1111_v15 = vpack.c.bf16 %v799_v13, %v799_v13  ;;  %v794_v16 = vmul.f32 %v1090_v8, %v788_v14  ;;  %818 = sbr.rel (!%p1438_p4) target bundleno = 1056 (0x420), region = 56 }
 0x3ea   : > { %810 = vst.msk [vmem:[%s1531_s10] sm:$0xf] %vm809_vm2, %v1111_v15  ;;  %v800_v17 = vadd.f32 %v1091_v10, %v794_v16 }
 0x3ec   : > { %v1112_v18 = vpack.c.bf16 %v800_v17, %v800_v17 }
 0x3ee   : > { %811 = vst.msk [vmem:[%s1531_s10 + $0x4] sm:$0xf] %vm809_vm2, %v1112_v18 }
 0x3ef   : > { %s1590_s27 = smov (!%p821_p8, %s820_s27), 2 }
 0x3f0   : > { %s1096_s17 = sshll.u32 %s1590_s27, 6 }
 0x3f1   : > { %p1099_p9 = scmp.eq.s32.totalorder %s1096_s17, 0 }
 0x3f2   : > { %s1548_s18 = sshrl.u32 (!%p1099_p9), %s1590_s27, 1 }
 0x3f3   : > { %829 = sbr.rel (%p1099_p9) target bundleno = 1056 (0x420), region = 60  ;;  %p1100_p10 = scmp.le.s32.totalorder (!%p1099_p9), %s1548_s18, 0 }
 0x3fa   : > { %998 = sbr.rel (%p1100_p10) target bundleno = 1035 (0x40b), region = 139  ;;  %s1334_s30 = smov (!%p1100_p10), %s1542_s16  }
 0x3fb   : > { %s1338_s13 = smov (!%p1100_p10), %s1531_s10   ;;  %s1342_s20 = smov (!%p1100_p10), 0  }
 0x3fc   : > { %s1346_s19 = smov (!%p1100_p10), 0  }
 0x401 LB: >> { %v845_v19 = vld [vmem:[%s1340_s13] sm:$0xf]  ;;  %v847_v20 = vld [vmem:[%s1340_s13 + $0x4] sm:$0xf]  ;;  %s849_s21 = sadd.s32 1, %s1344_s20  ;;  %s839_s19 = sadd.s32 1, %s1348_s19   ;;  %s1348_s19 = sphi %s1346_s19, %s839_s19   ;;  %s1344_s20 = sphi %s1342_s20, %s1343_s20   ;;  %s1340_s13 = sphi %s1338_s13, %s854_s13   ;;  %s1336_s30 = sphi %s1334_s30, %s855_s30  }
 0x402   : >> { %846 = vst [vmem:[%s1336_s30] sm:$0xf] %v845_v19  ;;  %848 = vst [vmem:[%s1336_s30 + $0x4] sm:$0xf] %v847_v20  ;;  %p850_p11 = scmp.ge.s32.totalorder %s849_s21, %s1548_s18  ;;  %p838_p12 = scmp.ge.s32.totalorder %s839_s19, %s1548_s18 }
 0x404   : >> { %s1592_s21 = smov (%p850_p11, %s849_s21), 0  ;;  %841 = sbr.rel (!%p838_p12) target bundleno = 1025 (0x401), region = 145 }
 0x405   : >> { %s1101_s22 = sshll.u32 %s1592_s21, 3  ;;  %s1343_s20 = smov %s1592_s21  }
 0x406   : >> { %s854_s13 = scalar_lea.vmem %s1531_s10, %s1101_s22 [#allocation2]   ;;  %s855_s30 = scalar_lea.vmem %s1542_s16, %s1101_s22  }
 0x40b PF: > { %s1558_s23 = sand.u32 1, %s1590_s27   ;;  %s1114_s24 = sshll.u32 %s1548_s18, 3 }
 0x40c   : > { %s860_s25 = scalar_lea.vmem %s1531_s10, %s1114_s24 [#allocation2]   ;;  %s862_s26 = scalar_lea.vmem %s1542_s16, %s1114_s24  }
 0x40d   : > { %p1106_p13 = scmp.le.s32.totalorder %s1558_s23, 0 }
 0x40e   : > { %s1350_s29 = smov (!%p1106_p13), %s862_s26   ;;  %s1354_s11 = smov (!%p1106_p13), %s860_s25  }
 0x40f   : > { %1012 = sbr.rel (%p1106_p13) target bundleno = 1056 (0x420), region = 150  ;;  %s1358_s14 = smov (!%p1106_p13), 0  }
 0x410   : > { %s1362_s15 = smov (!%p1106_p13), 0  }
 0x416 LB: >> { %v872_v21 = vld [vmem:[%s1356_s11] sm:$0xf]  ;;  %s874_s27 = sadd.s32 1, %s1360_s14  ;;  %s866_s15 = sadd.s32 1, %s1364_s15   ;;  %s1364_s15 = sphi %s1362_s15, %s866_s15   ;;  %s1360_s14 = sphi %s1358_s14, %s1359_s14   ;;  %s1356_s11 = sphi %s1354_s11, %s879_s11   ;;  %s1352_s29 = sphi %s1350_s29, %s880_s29  }
 0x417   : >> { %873 = vst [vmem:[%s1352_s29] sm:$0xf] %v872_v21  ;;  %p875_p0 = scmp.ge.s32.totalorder %s874_s27, %s1558_s23  ;;  %p865_p1 = scmp.ge.s32.totalorder %s866_s15, %s1558_s23 }
 0x419   : >> { %s1594_s27 = smov (%p875_p0, %s874_s27), 0  ;;  %868 = sbr.rel (!%p865_p1) target bundleno = 1046 (0x416), region = 156 }
 0x41a   : >> { %s1107_s10 = sshll.u32 %s1594_s27, 2  ;;  %s1359_s14 = smov %s1594_s27  }
 0x41b   : >> { %s879_s11 = scalar_lea.vmem %s860_s25, %s1107_s10 [#allocation2]   ;;  %s880_s29 = scalar_lea.vmem %s862_s26, %s1107_s10  }
 0x420 PF: > { %p15_p2 = scmp.ge.s32.totalorder %s1428_s9, 4   ;;  %s1586_s27 = smov %s1328_s28 }
 0x421   : > { %s1587_s28 = smov %s1436_s12  ;;  %s1588_s29 = smov %s1428_s9 }
 0x422   :  { %17 = sbr.rel (!%p15_p2) target bundleno = 2 (0x2), region = 167 }

// kernel: net_forward.17
= control target key start
LH: loop header
LB: loop body
LE: loop exit
PB: predicated region body
PF: predicated region fallthrough
CT: control target
= control target key end

     0   :  { %s1362_s0 = inlined_call_operand.<no memory space> [shape: f32[1], index: 0, kind: input, shape index: {}]   ;;  %s1363_s1 = inlined_call_operand.vmem [shape: bf16[24,32], index: 1, kind: input, shape index: {}]   ;;  %s1364_s2 = inlined_call_operand.vmem [shape: bf16[24,32], index: 2, kind: input, shape index: {}]   ;;  %s1365_s3 = inlined_call_operand.vmem [shape: bf16[24,32], index: 3, kind: input, shape index: {}]   ;;  %s1366_s4 = inlined_call_operand.vmem [shape: bf16[3,32,32], index: 4, kind: input, shape index: {}]   ;;  %s1367_s5 = inlined_call_operand.vmem [shape: f32[3,32], index: 5, kind: input, shape index: {}]   ;;  %s1368_s6 = inlined_call_operand.vmem [shape: f32[1,32], index: 6, kind: input, shape index: {}]   ;;  %s1369_s7 = inlined_call_operand.vmem [shape: f32[24,1], index: 7, kind: output, shape index: {}]  }
   0x1   :  { %12 = sst [smem:[#allocation2]] %s1362_s0 }
   0x2   :  { %s1231_s26 = smov 0   ;;  %s1233_s27 = smov 0  }
   0x3   :  { %s1235_s28 = smov 0  }
   0x4 LB: > { %s1244_s0 = sadd.s32 4294967295, %s1152_s28   ;;  %s1246_s29 = sadd.s32 1, %s1152_s28   ;;  %s1152_s28 = sphi %s1235_s28, %s1373_s28   ;;  %s1148_s27 = sphi %s1233_s27, %s1372_s27   ;;  %s1144_s26 = sphi %s1231_s26, %s1371_s26  }
   0x5   : > { %s184_s30 = ssub.s32 %s1152_s28, %s1246_s29  ;;  %s187_s8 = sadd.s32 1, %s1148_s27 }
   0x6   : > { %p185_p0 = scmp.eq.s32.totalorder %s184_s30, 0  ;;  %p197_p1 = scmp.ne.s32.totalorder %s1148_s27, %s1144_s26 }
   0x7   : > { %p198_p2 = scmp.eq.s32.totalorder %s1244_s0, 1  ;;  %p910_p3 = scmp.ge.s32.totalorder %s1152_s28, 1 }
   0x8   : > { %s1254_s9 = scalar_select %p185_p0, %s1148_s27, %s187_s8  }
   0x9   : > { %p1256_p4 = por %p198_p2, %p197_p1  ;;  %p285_p5 = scmp.lt.s32.totalorder %s1152_s28, 3 }
   0xb   : > { %p286_p6 = pnand %p910_p3, %p285_p5 }
   0xc   : > { %v1085_v0 = vld [vmem:[%s1366_s4 + $0x10] sm:$0xff] (!%p286_p6)   ;;  %v1186_v1 = vmov (!%p286_p6), 0.0   ;;  %v1086_v2 = vld [vmem:[%s1366_s4] sm:$0xff] (!%p286_p6)   ;;  %v1087_v3 = vld [vmem:[%s1366_s4 + $0x18] sm:$0xff] (!%p286_p6)   ;;  %vm1187_vm0 = vmmov (!%p286_p6), 0   ;;  %s1271_s17 = sshll.u32 (!%p286_p6), %s1244_s0, 1 }
   0xd   : > { %289 = sbr.rel (%p286_p6) target bundleno = 765 (0x2fd), region = 48  ;;  %971 = vmatprep.subr.bf16.mxu0 (!%p286_p6), %v1186_v1  ;;  %979 = vmatprep.subr.bf16.mxu1 (!%p286_p6), %v1186_v1  ;;  %v1088_v4 = vld [vmem:[%s1366_s4 + $0x8] sm:$0xff] (!%p286_p6)   ;;  %p343_p7 = scmp.lt.s32.totalorder (!%p286_p6), %s1271_s17, 2  ;;  %vm416_vm1 = vcmask (!%p286_p6), 261120   ;;  %v1091_v5 = vld [vmem:[%s1366_s4 + $0x20] sm:$0xff] (!%p286_p6)   ;;  %vm661_vm2 = vcmask (!%p286_p6), 7168  }
   0xe   : > { %972 = vmatpush3.bf16.msra.mxu0 (!%p286_p6), %v1085_v0  ;;  %975 = vmatprep.mubr.msk.bf16.mxu0 (!%p286_p6), %vm1187_vm0, %v1186_v1  ;;  %v1092_v8 = vld [vmem:[%s1366_s4 + $0x28] sm:$0xff] (!%p286_p6)   ;;  %v938_v21 = vld [vmem:[%s1367_s5] ss:$0 sm:$0xff] (!%p286_p6)  ;;  %v939_v50 = vld [vmem:[%s1367_s5 + $0x1] ss:$0 sm:$0xff] (!%p286_p6)  ;;  %s657_s28 = sld [smem:[#allocation2]] (!%p286_p6) }
   0xf   : > { %980 = vmatpush3.bf16.msra.mxu1 (!%p286_p6), %v1086_v2  ;;  %973 = vmatprep.subr.bf16.mxu0 (!%p286_p6), %v1186_v1  ;;  %v940_v52 = vld [vmem:[%s1367_s5 + $0x2] ss:$0 sm:$0xff] (!%p286_p6)  ;;  %v941_v55 = vld [vmem:[%s1368_s6] ss:$0 sm:$0xff] (!%p286_p6) }
  0x10   : > { %981 = vmatprep.subr.bf16.mxu1 (!%p286_p6), %v1186_v1  ;;  %983 = vmatprep.mubr.msk.bf16.mxu1 (!%p286_p6), %vm1187_vm0, %v1186_v1 }
  0x12   : > { %974 = vmatpush3.bf16.msra.mxu0 (!%p286_p6), %v1087_v3 }
  0x13   : > { %982 = vmatpush3.bf16.msra.mxu1 (!%p286_p6), %v1088_v4  ;;  %987 = vmatprep.subr.bf16.mxu0 (!%p286_p6), %v1186_v1 }
  0x14   : > { %s344_s20 = scalar_select %p343_p7, %s1271_s17, 2  ;;  %v658_v0 = vstv %s657_s28 }
  0x15   : > { %s672_s12 = ssub.s32 (%p1256_p4), 3, %s1271_s17 }
  0x16   : > { %s913_s21 = sshll.u32 %s344_s20, 2  ;;  %p673_p8 = scmp.lt.s32.totalorder (%p1256_p4), %s672_s12, 2 }
  0x17   : > { %s360_s24 = scalar_lea.vmem %s1364_s2, %s913_s21  ;;  %s346_s30 = scalar_lea.vmem %s1363_s1, %s913_s21 }
  0x18   : > { %v1089_v6 = vld [vmem:[%s360_s24] sm:$0xff]   ;;  %s374_s14 = scalar_lea.vmem %s1365_s3, %s913_s21 }
  0x19   : > { %v1090_v7 = vld [vmem:[%s346_s30] sm:$0xff]   ;;  %976 = vmatmul.mubr.msk.bf16.vlgmr.msra.gmra.mrb[0].mxu0 %vm416_vm1, %v1089_v6  ;;  %s335_s30 = sand.u32 1, %s1144_s26   ;;  %s959_s26 = sshll.u32 (%p1256_p4), %s1244_s0, 4 }
  0x1a   : > { %984 = vmatmul.mubr.msk.bf16.vlgmr.msra.gmra.mrb[0].mxu1 %vm416_vm1, %v1090_v7  ;;  %988 = vmatpush3.bf16.msra.mxu0 %v1091_v5  ;;  %v1093_v9 = vld [vmem:[%s374_s14] sm:$0xff]   ;;  %s911_s8 = sshll.u32 %s335_s30, 4  ;;  %s1328_s15 = scalar_lea.vmem (%p1256_p4), %s1369_s7, %s959_s26  }
  0x1b   : > { %989 = vmatprep.subr.bf16.mxu0 %v1186_v1  ;;  %991 = vmatprep.mubr.msk.bf16.mxu0 %vm1187_vm0, %v1186_v1  ;;  %s1317_s11 = scalar_lea.vmem [#allocation3], %s911_s8  }
  0x1e   : > { %990 = vmatpush3.bf16.msra.mxu0 %v1092_v8 }
  0x21   : > { %992 = vmatmul.mubr.msk.bf16.vlgmr.msra.gmra.mrb[4].mxu0 %vm416_vm1, %v1093_v9 }
  0xec   : > { %v454_v10 = vpop.f32.mrb[0].mxu0 }
  0xed   : > { %v515_v11 = vpop.f32.mrb[0].mxu1  ;;  %v977_v12 = vpop.f32.mrb[1].mxu0 }
  0xee   : > { %v516_v13 = vadd.f32 %v515_v11, %v454_v10  ;;  %v985_v14 = vpop.f32.mrb[1].mxu1  ;;  %v457_v15 = vpop.f32.mrb[2].mxu0 }
  0xef   : > { %v518_v16 = vpop.f32.mrb[2].mxu1  ;;  %v978_v17 = vpop.f32.mrb[3].mxu0 }
  0xf0   : > { %v519_v18 = vadd.f32 %v518_v16, %v457_v15  ;;  %v986_v19 = vpop.f32.mrb[3].mxu1 }
  0xf4   : > { %v583_v20 = vpop.f32.mrb[4].mxu0 }
  0xf5   : > { %v590_v22 = vadd.f32 %v583_v20, %v516_v13  ;;  %v993_v23 = vpop.f32.mrb[5].mxu0 }
  0xf6   : > { %v586_v24 = vpop.f32.mrb[6].mxu0 }
  0xf7   : > { %v591_v25 = vadd.f32 %v586_v24, %v519_v18  ;;  %v994_v26 = vpop.f32.mrb[7].mxu0  ;;  %v597_v27 = vadd.f32 %v938_v21, %v590_v22 }
  0xf9   : > { %v598_v28 = vadd.f32 %v938_v21, %v591_v25  ;;  %v599_v29 = vmax.f32 %v597_v27, 0.0 }
  0xfb   : > { %v601_v30 = vsel %vm416_vm1, %v599_v29, 0.0  ;;  %v600_v31 = vmax.f32 %v598_v28, 0.0 }
  0xfc   : > { %602 = vadd.xlane.f32.xlu0 %v601_v30 }
  0xfd   : > { %v604_v32 = vsel %vm416_vm1, %v600_v31, 0.0 }
 0x100   : > { %605 = vadd.xlane.f32.xlu0 %v604_v32 }
 0x189   : > { %v603_v33 = vpop.xlane.xlu0 %602 }
 0x18a   : > { %v608_v34 = vmul.f32 0.03125, %v603_v33 }
 0x18c   : > { %v610_v35 = vsub.f32 %v599_v29, %v608_v34 }
 0x18d   : > { %v606_v36 = vpop.xlane.xlu0 %605 }
 0x18e   : > { %v609_v37 = vmul.f32 0.03125, %v606_v36  ;;  %v612_v38 = vmul.f32 %v610_v35, %v610_v35 }
 0x190   : > { %v611_v39 = vsub.f32 %v600_v31, %v609_v37  ;;  %v614_v40 = vsel %vm416_vm1, %v612_v38, 0.0 }
 0x191   : > { %615 = vadd.xlane.f32.xlu1 %v614_v40 }
 0x192   : > { %v613_v41 = vmul.f32 %v611_v39, %v611_v39 }
 0x194   : > { %v617_v42 = vsel %vm416_vm1, %v613_v41, 0.0 }
 0x195   : > { %618 = vadd.xlane.f32.xlu1 %v617_v42 }
 0x21e   : > { %v616_v43 = vpop.xlane.xlu1 %615 }
 0x21f   : > { %v620_v44 = vmul.f32 0.03125, %v616_v43 }
 0x221   : > { %v622_v45 = vadd.f32 1e-05, %v620_v44 }
 0x222   : > { %v619_v46 = vpop.xlane.xlu1 %618 }
 0x223   : > { %1094 = vrsqrt.f32 %v622_v45  ;;  %v621_v47 = vmul.f32 0.03125, %v619_v46 }
 0x225   : > { %v623_v48 = vadd.f32 1e-05, %v621_v47 }
 0x227   : > { %1096 = vrsqrt.f32 %v623_v48 }
 0x22d   : > { %v1095_v49 = vpop.eup %1094 }
 0x22e   : > { %v626_v51 = vmul.f32 %v1095_v49, %v610_v35 }
 0x230   : > { %v633_v53 = vmul.f32 %v939_v50, %v626_v51 }
 0x231   : > { %v1097_v54 = vpop.eup %1096 }
 0x232   : > { %v640_v56 = vadd.f32 %v940_v52, %v633_v53  ;;  %v627_v57 = vmul.f32 %v1097_v54, %v611_v39 }
 0x234   : > { %v649_v58 = vmul.f32 %v941_v55, %v640_v56  ;;  %v634_v59 = vmul.f32 %v939_v50, %v627_v57 }
 0x236   : > { %v651_v60 = vsel %vm416_vm1, %v649_v58, 0.0  ;;  %v641_v61 = vadd.f32 %v940_v52, %v634_v59 }
 0x237   : > { %652 = vadd.xlane.f32.xlu0 %v651_v60 }
 0x238   : > { %v650_v62 = vmul.f32 %v941_v55, %v641_v61 }
 0x23a   : > { %v654_v63 = vsel %vm416_vm1, %v650_v62, 0.0 }
 0x23b   : > { %655 = vadd.xlane.f32.xlu1 %v654_v63 }
 0x2c4   : > { %v653_v1 = vpop.xlane.xlu0 %652 }
 0x2c5   : > { %v659_v2 = vadd.f32 %v658_v0, %v653_v1  ;;  %670 = sbr.rel (!%p1256_p4) target bundleno = 765 (0x2fd), region = 52 }
 0x2c7   : > { %662 = vst.msk [vmem:[%s1317_s11] sm:$0xff] %vm661_vm2, %v659_v2 }
 0x2c8   : > { %v656_v3 = vpop.xlane.xlu1 %655 }
 0x2c9   : > { %v660_v4 = vadd.f32 %v658_v0, %v656_v3 }
 0x2cb   : > { %663 = vst.msk [vmem:[%s1317_s11 + $0x8] sm:$0xff] %vm661_vm2, %v660_v4 }
 0x2cc   : > { %s1375_s12 = smov (!%p673_p8, %s672_s12), 2 }
 0x2cd   : > { %s944_s16 = sshll.u32 %s1375_s12, 7 }
 0x2ce   : > { %p947_p9 = scmp.eq.s32.totalorder %s944_s16, 0 }
 0x2cf   : > { %s1334_s18 = sshrl.u32 (!%p947_p9), %s1375_s12, 1 }
 0x2d0   : > { %681 = sbr.rel (%p947_p9) target bundleno = 765 (0x2fd), region = 56  ;;  %p948_p10 = scmp.le.s32.totalorder (!%p947_p9), %s1334_s18, 0 }
 0x2d7   : > { %851 = sbr.rel (%p948_p10) target bundleno = 744 (0x2e8), region = 140  ;;  %s1154_s0 = smov (!%p948_p10), %s1328_s15  }
 0x2d8   : > { %s1158_s10 = smov (!%p948_p10), %s1317_s11   ;;  %s1162_s17 = smov (!%p948_p10), 0  }
 0x2d9   : > { %s1166_s19 = smov (!%p948_p10), 0  }
 0x2de LB: >> { %v745_v5 = vld [vmem:[%s1160_s10] sm:$0xff]  ;;  %v747_v6 = vld [vmem:[%s1160_s10 + $0x8] sm:$0xff]  ;;  %s749_s20 = sadd.s32 1, %s1164_s17  ;;  %s739_s19 = sadd.s32 1, %s1168_s19   ;;  %s1168_s19 = sphi %s1166_s19, %s739_s19   ;;  %s1164_s17 = sphi %s1162_s17, %s1163_s17   ;;  %s1160_s10 = sphi %s1158_s10, %s754_s10   ;;  %s1156_s0 = sphi %s1154_s0, %s755_s0  }
 0x2df   : >> { %746 = vst [vmem:[%s1156_s0] sm:$0xff] %v745_v5  ;;  %748 = vst [vmem:[%s1156_s0 + $0x8] sm:$0xff] %v747_v6  ;;  %p750_p11 = scmp.ge.s32.totalorder %s749_s20, %s1334_s18  ;;  %p738_p12 = scmp.ge.s32.totalorder %s739_s19, %s1334_s18 }
 0x2e1   : >> { %s1377_s20 = smov (%p750_p11, %s749_s20), 0  ;;  %741 = sbr.rel (!%p738_p12) target bundleno = 734 (0x2de), region = 146 }
 0x2e2   : >> { %s949_s21 = sshll.u32 %s1377_s20, 4  ;;  %s1163_s17 = smov %s1377_s20  }
 0x2e3   : >> { %s754_s10 = scalar_lea.vmem %s1317_s11, %s949_s21 [#allocation3]   ;;  %s755_s0 = scalar_lea.vmem %s1328_s15, %s949_s21  }
 0x2e8 PF: > { %s1344_s22 = sand.u32 1, %s1375_s12   ;;  %s960_s23 = sshll.u32 %s1334_s18, 4 }
 0x2e9   : > { %s760_s24 = scalar_lea.vmem %s1317_s11, %s960_s23 [#allocation3]   ;;  %s762_s25 = scalar_lea.vmem %s1328_s15, %s960_s23  }
 0x2ea   : > { %p954_p13 = scmp.le.s32.totalorder %s1344_s22, 0 }
 0x2eb   : > { %s1170_s28 = smov (!%p954_p13), %s762_s25   ;;  %s1174_s30 = smov (!%p954_p13), %s760_s24  }
 0x2ec   : > { %865 = sbr.rel (%p954_p13) target bundleno = 765 (0x2fd), region = 151  ;;  %s1178_s8 = smov (!%p954_p13), 0  }
 0x2ed   : > { %s1182_s26 = smov (!%p954_p13), 0  }
 0x2f3 LB: >> { %v772_v7 = vld [vmem:[%s1176_s30] sm:$0xff]  ;;  %s774_s12 = sadd.s32 1, %s1180_s8  ;;  %s766_s26 = sadd.s32 1, %s1184_s26   ;;  %s1184_s26 = sphi %s1182_s26, %s766_s26   ;;  %s1180_s8 = sphi %s1178_s8, %s1179_s8   ;;  %s1176_s30 = sphi %s1174_s30, %s779_s30   ;;  %s1172_s28 = sphi %s1170_s28, %s780_s28  }
 0x2f4   : >> { %773 = vst [vmem:[%s1172_s28] sm:$0xff] %v772_v7  ;;  %p775_p0 = scmp.ge.s32.totalorder %s774_s12, %s1344_s22  ;;  %p765_p1 = scmp.ge.s32.totalorder %s766_s26, %s1344_s22 }
 0x2f6   : >> { %s1379_s12 = smov (%p775_p0, %s774_s12), 0  ;;  %768 = sbr.rel (!%p765_p1) target bundleno = 755 (0x2f3), region = 157 }
 0x2f7   : >> { %s955_s11 = sshll.u32 %s1379_s12, 3  ;;  %s1179_s8 = smov %s1379_s12  }
 0x2f8   : >> { %s779_s30 = scalar_lea.vmem %s760_s24, %s955_s11 [#allocation3]   ;;  %s780_s28 = scalar_lea.vmem %s762_s25, %s955_s11  }
 0x2fd PF: > { %p15_p2 = scmp.ge.s32.totalorder %s1246_s29, 4   ;;  %s1371_s26 = smov %s1148_s27 }
 0x2fe   : > { %s1372_s27 = smov %s1254_s9  ;;  %s1373_s28 = smov %s1246_s29 }
 0x2ff   :  { %17 = sbr.rel (!%p15_p2) target bundleno = 4 (0x4), region = 168 }

</bundles_post_ra>
